<compile_context>
chip_gen: v7x
topology: tpu7x:2x2x1
jax: 0.10.0
libtpu: 0.0.40
codegen_flags: <defaults>
</compile_context>

<pallas_src>
import numpy as np
import jax
import jax.numpy as jnp
from jax.experimental import pallas as pl
from jax.experimental.pallas import tpu as pltpu

# ----- small config consistent with the module -----
VOCAB_SIZE = 16        # len(vocab)
HIDDEN = 32            # hidden_size
N_LAYERS = 2           # n_layers (>= 2 for this script)
BATCH = 2
SEQ = 8


def _lstm_fc_kernel(add_ref, len_ref, wbig_ref, wfc_ref, bfc_ref,
                    logits_ref, h_out_ref, c_out_ref, out_acc):
    """Whole packed multi-layer LSTM + fc in one invocation (grid=(1,))."""
    n_layers, B, H = h_out_ref.shape
    G = 4 * H
    T = out_acc.shape[0] // B
    n_waves = add_ref.shape[0]            # == T + n_layers - 1

    # ---- hoisted loop invariants (loaded once, vreg-resident) ----
    len_col = len_ref[...]                # (B, 1) int32 sequence lengths
    w_big = wbig_ref[...]                 # ((2L-1)H, 4HL) block-diagonal recurrent weight

    zeros_bh = jnp.zeros((B, H), jnp.float32)
    h = [zeros_bh] * n_layers             # frozen recurrent state per layer
    c = [zeros_bh] * n_layers
    d = [zeros_bh] * n_layers             # raw layer outputs from the previous wave

    # Static (fully unrolled) wave loop: state stays in vregs, all ref indices
    # are static; trip count T + L - 1 is tiny so live ranges are not an issue.
    for w in range(n_waves):
        # Snapshot of last wave's state -> every layer's gate matmul this wave
        # is independent, so one fused block-diagonal MXU push covers them all.
        pieces = [h[0]]
        for l in range(1, n_layers):
            pieces += [d[l - 1], h[l]]
        zin = pieces[0] if len(pieces) == 1 else jnp.concatenate(pieces, axis=-1)
        gates = add_ref[w] + jnp.dot(zin, w_big,
                                     preferred_element_type=jnp.float32)   # (B, 4HL)
        # Single full-width EUP push; g-gate columns were pre-scaled by 2 in
        # the wrapper so tanh(g_pre) == 2*sigmoid(2*g_pre) - 1.
        sg = jax.nn.sigmoid(gates)

        d_new = list(d)
        for l in range(n_layers):
            t = w - l                      # wavefront: layer l is one step behind l-1
            if 0 <= t < T:                 # static schedule
                s = sg[:, l * G:(l + 1) * G]
                i_g = s[:, 0 * H:1 * H]    # PyTorch gate order: i, f, g, o
                f_g = s[:, 1 * H:2 * H]
                g_g = 2.0 * s[:, 2 * H:3 * H] - 1.0
                o_g = s[:, 3 * H:4 * H]
                c_new = f_g * c[l] + i_g * g_g
                h_new = o_g * jnp.tanh(c_new)
                valid = t < len_col        # (B, 1) packed-sequence validity mask
                h[l] = jnp.where(valid, h_new, h[l])
                c[l] = jnp.where(valid, c_new, c[l])
                d_new[l] = h_new
                if l == n_layers - 1:
                    # pad_packed_sequence: padded rows are zero before fc
                    out_acc[pl.ds(t * B, B), :] = jnp.where(valid, h_new, 0.0)
        d = d_new

    # ---- fc epilogue: one matmul over all timesteps, lane-dense 128-wide out ----
    logits_ref[...] = (jnp.dot(out_acc[...], wfc_ref[...],
                               preferred_element_type=jnp.float32) + bfc_ref[...])

    # final (h, c): written exactly once from vreg-resident state
    for l in range(n_layers):
        h_out_ref[l] = h[l]
        c_out_ref[l] = c[l]


def init_params(key):
    ks = jax.random.split(key, 6)
    s = 1.0 / np.sqrt(HIDDEN)
    u = lambda k, shp: jax.random.uniform(k, shp, jnp.float32, -s, s)
    return dict(
        wx0=u(ks[0], (VOCAB_SIZE, 4 * HIDDEN)),                 # layer-0 W_ih^T
        wxr=u(ks[1], (N_LAYERS - 1, HIDDEN, 4 * HIDDEN)),       # layers>0 W_ih^T
        wh=u(ks[2], (N_LAYERS, HIDDEN, 4 * HIDDEN)),            # W_hh^T
        b=u(ks[3], (N_LAYERS, 1, 4 * HIDDEN)),                  # b_ih + b_hh combined
        wfc=u(ks[4], (HIDDEN, VOCAB_SIZE)),                     # fc.weight^T
        bfc=u(ks[5], (1, VOCAB_SIZE)),                          # fc.bias
    )


def rnn_simple_generator_forward(x_ids, lengths, params):
    """x_ids: (B, T) int token ids; lengths: (B,) host ints (like len_X)."""
    lengths = np.asarray(lengths)
    t_out = int(lengths.max())                 # pad_packed_sequence max length
    B = x_ids.shape[0]
    H, L, V = HIDDEN, N_LAYERS, VOCAB_SIZE
    G = 4 * H
    v_pad = ((V + 127) // 128) * 128           # lane-dense fc output width

    wx0, wxr, wh, b, wfc, bfc = (params[k] for k in
                                 ("wx0", "wxr", "wh", "b", "wfc", "bfc"))

    # fold the x2 g-gate scale (tanh(x) = 2*sigmoid(2x) - 1) into every term
    # that feeds the gates, so the kernel does a single sigmoid per wave.
    def scale_g(a):                            # last dim == 4H
        return a.at[..., 2 * H:3 * H].multiply(2.0)

    # one_hot(x) @ W_ih is a row gather; hoist it (plus layer-0 bias) out of
    # the recurrence entirely -- shape (T, B, 4H), time-major.
    xw0 = scale_g(jnp.take(wx0, x_ids[:, :t_out], axis=0) + b[0])    # (B, T, 4H)
    xw0_tm = jnp.transpose(xw0, (1, 0, 2))                           # (T, B, 4H)

    # per-wave additive term: [layer-0 x-proj+bias | layer>=1 biases]
    n_waves = t_out + L - 1
    add = jnp.zeros((n_waves, B, G * L), jnp.float32)
    add = add.at[:t_out, :, 0:G].set(xw0_tm)
    for l in range(1, L):
        add = add.at[:, :, G * l:G * (l + 1)].set(
            jnp.broadcast_to(scale_g(b[l]), (n_waves, B, G)))

    # block-diagonal recurrent weight; zin layout is [h0 | d0, h1 | d1, h2 ...]
    zin_w = (2 * L - 1) * H
    w_big = jnp.zeros((zin_w, G * L), jnp.float32)
    w_big = w_big.at[0:H, 0:G].set(scale_g(wh[0]))
    for l in range(1, L):
        r0 = (2 * l - 1) * H
        w_big = w_big.at[r0:r0 + H, G * l:G * (l + 1)].set(scale_g(wxr[l - 1]))
        w_big = w_big.at[r0 + H:r0 + 2 * H, G * l:G * (l + 1)].set(scale_g(wh[l]))

    # lane-dense fc weights (pad V -> multiple of 128 output lanes)
    wfc_pad = jnp.zeros((H, v_pad), jnp.float32).at[:, :V].set(wfc)
    bfc_pad = jnp.zeros((1, v_pad), jnp.float32).at[:, :V].set(bfc)

    len_col = jnp.asarray(lengths.astype(np.int32)).reshape(B, 1)

    def full(arr):
        nd = arr.ndim
        return pl.BlockSpec(arr.shape, lambda i, nd=nd: (0,) * nd)

    logits_pad, h, c = pl.pallas_call(
        _lstm_fc_kernel,
        out_shape=(
            jax.ShapeDtypeStruct((t_out * B, v_pad), jnp.float32),
            jax.ShapeDtypeStruct((L, B, H), jnp.float32),
            jax.ShapeDtypeStruct((L, B, H), jnp.float32),
        ),
        grid_spec=pltpu.PrefetchScalarGridSpec(
            num_scalar_prefetch=0,
            grid=(1,),                       # single invocation; wave loop is in-kernel
            in_specs=[full(add), full(len_col), full(w_big),
                      full(wfc_pad), full(bfc_pad)],
            out_specs=(
                pl.BlockSpec((t_out * B, v_pad), lambda i: (0, 0)),
                pl.BlockSpec((L, B, H), lambda i: (0, 0, 0)),
                pl.BlockSpec((L, B, H), lambda i: (0, 0, 0)),
            ),
            scratch_shapes=[
                pltpu.VMEM((t_out * B, H), jnp.float32),   # masked top-layer outputs
            ],
        ),
        compiler_params=pltpu.CompilerParams(
            dimension_semantics=("arbitrary",)),
    )(add, len_col, w_big, wfc_pad, bfc_pad)

    logits = logits_pad[:, :V].reshape(t_out, B, V)
    logits = jnp.transpose(logits, (1, 0, 2))  # back to batch_first (B, T_out, V)
    return logits, lengths, (h, c)


def reference_forward(x_ids, lengths, params):
    """Pure numpy reference of the same packed-LSTM + fc forward (unfused weights)."""
    lengths = np.asarray(lengths)
    t_out = int(lengths.max())
    B = x_ids.shape[0]
    x_oh = np.asarray(jax.nn.one_hot(x_ids[:, :t_out], VOCAB_SIZE, dtype=jnp.float32))
    wx0, wxr, wh, b, wfc, bfc = (np.asarray(params[k]) for k in
                                 ("wx0", "wxr", "wh", "b", "wfc", "bfc"))
    h = np.zeros((N_LAYERS, B, HIDDEN), np.float32)
    c = np.zeros((N_LAYERS, B, HIDDEN), np.float32)
    outs = np.zeros((B, t_out, HIDDEN), np.float32)
    sig = lambda z: 1.0 / (1.0 + np.exp(-z))
    for t in range(t_out):
        m = (t < lengths).astype(np.float32)[:, None]
        layer_in = x_oh[:, t, :]
        for l in range(N_LAYERS):
            wx = wx0 if l == 0 else wxr[l - 1]
            g = layer_in @ wx + h[l] @ wh[l] + b[l]
            i_g = sig(g[:, :HIDDEN]); f_g = sig(g[:, HIDDEN:2 * HIDDEN])
            g_g = np.tanh(g[:, 2 * HIDDEN:3 * HIDDEN]); o_g = sig(g[:, 3 * HIDDEN:])
            c_new = f_g * c[l] + i_g * g_g
            h_new = o_g * np.tanh(c_new)
            h[l] = m * h_new + (1 - m) * h[l]
            c[l] = m * c_new + (1 - m) * c[l]
            layer_in = h_new
        outs[:, t, :] = m * h[N_LAYERS - 1]
    logits = outs @ wfc + bfc
    return logits, (h, c)


if __name__ == "__main__":
    key = jax.random.PRNGKey(0)
    pkey, xkey = jax.random.split(key)
    params = init_params(pkey)

    x_ids = jax.random.randint(xkey, (BATCH, SEQ), 0, VOCAB_SIZE, dtype=jnp.int32)
    len_x = np.array([SEQ, SEQ - 3], dtype=np.int32)   # variable-length sequences

    logits, len_out, (h, c) = rnn_simple_generator_forward(x_ids, len_x, params)
    jax.block_until_ready((logits, h, c))

    ref_logits, (ref_h, ref_c) = reference_forward(x_ids, len_x, params)
    np.testing.assert_allclose(np.asarray(logits), ref_logits, rtol=1e-4, atol=1e-4)
    np.testing.assert_allclose(np.asarray(h), ref_h, rtol=1e-4, atol=1e-4)
    np.testing.assert_allclose(np.asarray(c), ref_c, rtol=1e-4, atol=1e-4)

    print("KERNEL_OK")
</pallas_src>

<mosaic_0001>
module attributes {stable_mosaic.version = 11 : i64} {
  func.func @_lstm_fc_kernel(%arg0: i32, %arg1: memref<9x2x256xf32, #tpu.memory_space<vmem>>, %arg2: memref<2x1xi32, #tpu.memory_space<vmem>>, %arg3: memref<96x256xf32, #tpu.memory_space<vmem>>, %arg4: memref<32x128xf32, #tpu.memory_space<vmem>>, %arg5: memref<1x128xf32, #tpu.memory_space<vmem>>, %arg6: memref<16x128xf32, #tpu.memory_space<vmem>>, %arg7: memref<2x2x32xf32, #tpu.memory_space<vmem>>, %arg8: memref<2x2x32xf32, #tpu.memory_space<vmem>>, %arg9: memref<16x32xf32, #tpu.memory_space<vmem>>) attributes {dimension_semantics = [#tpu.dimension_semantics<arbitrary>], iteration_bounds = array<i64: 1>, scalar_prefetch = 0 : i64, scratch_operands = 1 : i64, tpu.core_type = #tpu.core_type<tc>, window_params = [{pipeline_mode = #tpu.pipeline_mode<synchronous>, transform_indices = @transform_0, window_bounds = array<i64: 9, 2, 256>}, {pipeline_mode = #tpu.pipeline_mode<synchronous>, transform_indices = @transform_1, window_bounds = array<i64: 2, 1>}, {pipeline_mode = #tpu.pipeline_mode<synchronous>, transform_indices = @transform_2, window_bounds = array<i64: 96, 256>}, {pipeline_mode = #tpu.pipeline_mode<synchronous>, transform_indices = @transform_3, window_bounds = array<i64: 32, 128>}, {pipeline_mode = #tpu.pipeline_mode<synchronous>, transform_indices = @transform_4, window_bounds = array<i64: 1, 128>}, {pipeline_mode = #tpu.pipeline_mode<synchronous>, transform_indices = @transform_5, window_bounds = array<i64: 16, 128>}, {pipeline_mode = #tpu.pipeline_mode<synchronous>, transform_indices = @transform_6, window_bounds = array<i64: 2, 2, 32>}, {pipeline_mode = #tpu.pipeline_mode<synchronous>, transform_indices = @transform_7, window_bounds = array<i64: 2, 2, 32>}]} {
    %c0 = arith.constant 0 : index
    %c0_0 = arith.constant 0 : index
    %0 = vector.load %arg2[%c0, %c0_0] : memref<2x1xi32, #tpu.memory_space<vmem>>, vector<2x1xi32>
    %c0_1 = arith.constant 0 : index
    %c0_2 = arith.constant 0 : index
    %1 = vector.load %arg3[%c0_1, %c0_2] : memref<96x256xf32, #tpu.memory_space<vmem>>, vector<96x256xf32>
    %cst = arith.constant 0.000000e+00 : f32
    %2 = vector.broadcast %cst : f32 to vector<2x32xf32>
    %3 = tpu.concatenate %2, %2, %2 in 1 : vector<2x32xf32>, vector<2x32xf32>, vector<2x32xf32> -> vector<2x96xf32>
    %c0_3 = arith.constant 0 : index
    %c0_4 = arith.constant 0 : index
    %c0_5 = arith.constant 0 : index
    %4 = vector.load %arg1[%c0_3, %c0_4, %c0_5] : memref<9x2x256xf32, #tpu.memory_space<vmem>>, vector<1x2x256xf32>
    %5 = vector.shape_cast %4 : vector<1x2x256xf32> to vector<2x256xf32>
    %cst_6 = arith.constant dense<0.000000e+00> : vector<2x256xf32>
    %6 = tpu.matmul %3, %1, %cst_6 {dimension_numbers = #tpu.dot_dimension_numbers<[1], [0], [0], [1], [0, 0, 1, 1], [], []>} : vector<2x96xf32>, vector<96x256xf32>, vector<2x256xf32> -> vector<2x256xf32>
    %7 = arith.addf %5, %6 : vector<2x256xf32>
    %8 = arith.negf %7 : vector<2x256xf32>
    %9 = math.exp %8 : vector<2x256xf32>
    %cst_7 = arith.constant 1.000000e+00 : f32
    %10 = vector.broadcast %cst_7 : f32 to vector<2x256xf32>
    %11 = arith.addf %10, %9 : vector<2x256xf32>
    %12 = arith.divf %10, %11 : vector<2x256xf32>
    %13 = vector.extract_strided_slice %12 {offsets = [0, 0], sizes = [2, 128], strides = [1, 1]} : vector<2x256xf32> to vector<2x128xf32>
    %14 = vector.extract_strided_slice %13 {offsets = [0, 0], sizes = [2, 32], strides = [1, 1]} : vector<2x128xf32> to vector<2x32xf32>
    %15 = vector.extract_strided_slice %13 {offsets = [0, 32], sizes = [2, 32], strides = [1, 1]} : vector<2x128xf32> to vector<2x32xf32>
    %16 = vector.extract_strided_slice %13 {offsets = [0, 64], sizes = [2, 32], strides = [1, 1]} : vector<2x128xf32> to vector<2x32xf32>
    %cst_8 = arith.constant 2.000000e+00 : f32
    %17 = vector.broadcast %cst_8 : f32 to vector<2x32xf32>
    %18 = arith.mulf %17, %16 : vector<2x32xf32>
    %cst_9 = arith.constant 1.000000e+00 : f32
    %19 = vector.broadcast %cst_9 : f32 to vector<2x32xf32>
    %20 = arith.subf %18, %19 : vector<2x32xf32>
    %21 = vector.extract_strided_slice %13 {offsets = [0, 96], sizes = [2, 32], strides = [1, 1]} : vector<2x128xf32> to vector<2x32xf32>
    %22 = arith.mulf %15, %2 : vector<2x32xf32>
    %23 = arith.mulf %14, %20 : vector<2x32xf32>
    %24 = arith.addf %22, %23 : vector<2x32xf32>
    %25 = math.tanh %24 : vector<2x32xf32>
    %26 = arith.mulf %21, %25 : vector<2x32xf32>
    %c0_i32 = arith.constant 0 : i32
    %27 = vector.broadcast %c0_i32 : i32 to vector<2x1xi32>
    %28 = arith.cmpi sgt, %0, %27 : vector<2x1xi32>
    %29 = vector.shape_cast %28 : vector<2x1xi1> to vector<2x1xi1>
    %30 = vector.broadcast %29 : vector<2x1xi1> to vector<2x32xi1>
    %31 = arith.select %30, %26, %2 : vector<2x32xi1>, vector<2x32xf32>
    %32 = vector.shape_cast %28 : vector<2x1xi1> to vector<2x1xi1>
    %33 = vector.broadcast %32 : vector<2x1xi1> to vector<2x32xi1>
    %34 = arith.select %33, %24, %2 : vector<2x32xi1>, vector<2x32xf32>
    %35 = tpu.concatenate %31, %26, %2 in 1 : vector<2x32xf32>, vector<2x32xf32>, vector<2x32xf32> -> vector<2x96xf32>
    %c1 = arith.constant 1 : index
    %c0_10 = arith.constant 0 : index
    %c0_11 = arith.constant 0 : index
    %36 = vector.load %arg1[%c1, %c0_10, %c0_11] : memref<9x2x256xf32, #tpu.memory_space<vmem>>, vector<1x2x256xf32>
    %37 = vector.shape_cast %36 : vector<1x2x256xf32> to vector<2x256xf32>
    %cst_12 = arith.constant dense<0.000000e+00> : vector<2x256xf32>
    %38 = tpu.matmul %35, %1, %cst_12 {dimension_numbers = #tpu.dot_dimension_numbers<[1], [0], [0], [1], [0, 0, 1, 1], [], []>} : vector<2x96xf32>, vector<96x256xf32>, vector<2x256xf32> -> vector<2x256xf32>
    %39 = arith.addf %37, %38 : vector<2x256xf32>
    %40 = arith.negf %39 : vector<2x256xf32>
    %41 = math.exp %40 : vector<2x256xf32>
    %cst_13 = arith.constant 1.000000e+00 : f32
    %42 = vector.broadcast %cst_13 : f32 to vector<2x256xf32>
    %43 = arith.addf %42, %41 : vector<2x256xf32>
    %44 = arith.divf %42, %43 : vector<2x256xf32>
    %45 = vector.extract_strided_slice %44 {offsets = [0, 0], sizes = [2, 128], strides = [1, 1]} : vector<2x256xf32> to vector<2x128xf32>
    %46 = vector.extract_strided_slice %45 {offsets = [0, 0], sizes = [2, 32], strides = [1, 1]} : vector<2x128xf32> to vector<2x32xf32>
    %47 = vector.extract_strided_slice %45 {offsets = [0, 32], sizes = [2, 32], strides = [1, 1]} : vector<2x128xf32> to vector<2x32xf32>
    %48 = vector.extract_strided_slice %45 {offsets = [0, 64], sizes = [2, 32], strides = [1, 1]} : vector<2x128xf32> to vector<2x32xf32>
    %cst_14 = arith.constant 2.000000e+00 : f32
    %49 = vector.broadcast %cst_14 : f32 to vector<2x32xf32>
    %50 = arith.mulf %49, %48 : vector<2x32xf32>
    %cst_15 = arith.constant 1.000000e+00 : f32
    %51 = vector.broadcast %cst_15 : f32 to vector<2x32xf32>
    %52 = arith.subf %50, %51 : vector<2x32xf32>
    %53 = vector.extract_strided_slice %45 {offsets = [0, 96], sizes = [2, 32], strides = [1, 1]} : vector<2x128xf32> to vector<2x32xf32>
    %54 = arith.mulf %47, %34 : vector<2x32xf32>
    %55 = arith.mulf %46, %52 : vector<2x32xf32>
    %56 = arith.addf %54, %55 : vector<2x32xf32>
    %57 = math.tanh %56 : vector<2x32xf32>
    %58 = arith.mulf %53, %57 : vector<2x32xf32>
    %c1_i32 = arith.constant 1 : i32
    %59 = vector.broadcast %c1_i32 : i32 to vector<2x1xi32>
    %60 = arith.cmpi sgt, %0, %59 : vector<2x1xi32>
    %61 = vector.shape_cast %60 : vector<2x1xi1> to vector<2x1xi1>
    %62 = vector.broadcast %61 : vector<2x1xi1> to vector<2x32xi1>
    %63 = arith.select %62, %58, %31 : vector<2x32xi1>, vector<2x32xf32>
    %64 = vector.shape_cast %60 : vector<2x1xi1> to vector<2x1xi1>
    %65 = vector.broadcast %64 : vector<2x1xi1> to vector<2x32xi1>
    %66 = arith.select %65, %56, %34 : vector<2x32xi1>, vector<2x32xf32>
    %67 = vector.extract_strided_slice %44 {offsets = [0, 128], sizes = [2, 128], strides = [1, 1]} : vector<2x256xf32> to vector<2x128xf32>
    %68 = vector.extract_strided_slice %67 {offsets = [0, 0], sizes = [2, 32], strides = [1, 1]} : vector<2x128xf32> to vector<2x32xf32>
    %69 = vector.extract_strided_slice %67 {offsets = [0, 32], sizes = [2, 32], strides = [1, 1]} : vector<2x128xf32> to vector<2x32xf32>
    %70 = vector.extract_strided_slice %67 {offsets = [0, 64], sizes = [2, 32], strides = [1, 1]} : vector<2x128xf32> to vector<2x32xf32>
    %cst_16 = arith.constant 2.000000e+00 : f32
    %71 = vector.broadcast %cst_16 : f32 to vector<2x32xf32>
    %72 = arith.mulf %71, %70 : vector<2x32xf32>
    %cst_17 = arith.constant 1.000000e+00 : f32
    %73 = vector.broadcast %cst_17 : f32 to vector<2x32xf32>
    %74 = arith.subf %72, %73 : vector<2x32xf32>
    %75 = vector.extract_strided_slice %67 {offsets = [0, 96], sizes = [2, 32], strides = [1, 1]} : vector<2x128xf32> to vector<2x32xf32>
    %76 = arith.mulf %69, %2 : vector<2x32xf32>
    %77 = arith.mulf %68, %74 : vector<2x32xf32>
    %78 = arith.addf %76, %77 : vector<2x32xf32>
    %79 = math.tanh %78 : vector<2x32xf32>
    %80 = arith.mulf %75, %79 : vector<2x32xf32>
    %c0_i32_18 = arith.constant 0 : i32
    %81 = vector.broadcast %c0_i32_18 : i32 to vector<2x1xi32>
    %82 = arith.cmpi sgt, %0, %81 : vector<2x1xi32>
    %83 = vector.shape_cast %82 : vector<2x1xi1> to vector<2x1xi1>
    %84 = vector.broadcast %83 : vector<2x1xi1> to vector<2x32xi1>
    %85 = arith.select %84, %80, %2 : vector<2x32xi1>, vector<2x32xf32>
    %86 = vector.shape_cast %82 : vector<2x1xi1> to vector<2x1xi1>
    %87 = vector.broadcast %86 : vector<2x1xi1> to vector<2x32xi1>
    %88 = arith.select %87, %78, %2 : vector<2x32xi1>, vector<2x32xf32>
    %cst_19 = arith.constant 0.000000e+00 : f32
    %89 = vector.shape_cast %82 : vector<2x1xi1> to vector<2x1xi1>
    %90 = vector.broadcast %89 : vector<2x1xi1> to vector<2x32xi1>
    %91 = vector.broadcast %cst_19 : f32 to vector<2x32xf32>
    %92 = arith.select %90, %80, %91 : vector<2x32xi1>, vector<2x32xf32>
    %c0_20 = arith.constant 0 : index
    %c0_21 = arith.constant 0 : index
    %93 = vector.load %arg9[%c0_20, %c0_21] : memref<16x32xf32, #tpu.memory_space<vmem>>, vector<2x32xf32>
    tpu.vector_store %arg9[%c0_20, %c0_21], %92 {strides = array<i32>} : memref<16x32xf32, #tpu.memory_space<vmem>>, vector<2x32xf32>,
    %94 = tpu.concatenate %63, %58, %85 in 1 : vector<2x32xf32>, vector<2x32xf32>, vector<2x32xf32> -> vector<2x96xf32>
    %c2 = arith.constant 2 : index
    %c0_22 = arith.constant 0 : index
    %c0_23 = arith.constant 0 : index
    %95 = vector.load %arg1[%c2, %c0_22, %c0_23] : memref<9x2x256xf32, #tpu.memory_space<vmem>>, vector<1x2x256xf32>
    %96 = vector.shape_cast %95 : vector<1x2x256xf32> to vector<2x256xf32>
    %cst_24 = arith.constant dense<0.000000e+00> : vector<2x256xf32>
    %97 = tpu.matmul %94, %1, %cst_24 {dimension_numbers = #tpu.dot_dimension_numbers<[1], [0], [0], [1], [0, 0, 1, 1], [], []>} : vector<2x96xf32>, vector<96x256xf32>, vector<2x256xf32> -> vector<2x256xf32>
    %98 = arith.addf %96, %97 : vector<2x256xf32>
    %99 = arith.negf %98 : vector<2x256xf32>
    %100 = math.exp %99 : vector<2x256xf32>
    %cst_25 = arith.constant 1.000000e+00 : f32
    %101 = vector.broadcast %cst_25 : f32 to vector<2x256xf32>
    %102 = arith.addf %101, %100 : vector<2x256xf32>
    %103 = arith.divf %101, %102 : vector<2x256xf32>
    %104 = vector.extract_strided_slice %103 {offsets = [0, 0], sizes = [2, 128], strides = [1, 1]} : vector<2x256xf32> to vector<2x128xf32>
    %105 = vector.extract_strided_slice %104 {offsets = [0, 0], sizes = [2, 32], strides = [1, 1]} : vector<2x128xf32> to vector<2x32xf32>
    %106 = vector.extract_strided_slice %104 {offsets = [0, 32], sizes = [2, 32], strides = [1, 1]} : vector<2x128xf32> to vector<2x32xf32>
    %107 = vector.extract_strided_slice %104 {offsets = [0, 64], sizes = [2, 32], strides = [1, 1]} : vector<2x128xf32> to vector<2x32xf32>
    %cst_26 = arith.constant 2.000000e+00 : f32
    %108 = vector.broadcast %cst_26 : f32 to vector<2x32xf32>
    %109 = arith.mulf %108, %107 : vector<2x32xf32>
    %cst_27 = arith.constant 1.000000e+00 : f32
    %110 = vector.broadcast %cst_27 : f32 to vector<2x32xf32>
    %111 = arith.subf %109, %110 : vector<2x32xf32>
    %112 = vector.extract_strided_slice %104 {offsets = [0, 96], sizes = [2, 32], strides = [1, 1]} : vector<2x128xf32> to vector<2x32xf32>
    %113 = arith.mulf %106, %66 : vector<2x32xf32>
    %114 = arith.mulf %105, %111 : vector<2x32xf32>
    %115 = arith.addf %113, %114 : vector<2x32xf32>
    %116 = math.tanh %115 : vector<2x32xf32>
    %117 = arith.mulf %112, %116 : vector<2x32xf32>
    %c2_i32 = arith.constant 2 : i32
    %118 = vector.broadcast %c2_i32 : i32 to vector<2x1xi32>
    %119 = arith.cmpi sgt, %0, %118 : vector<2x1xi32>
    %120 = vector.shape_cast %119 : vector<2x1xi1> to vector<2x1xi1>
    %121 = vector.broadcast %120 : vector<2x1xi1> to vector<2x32xi1>
    %122 = arith.select %121, %117, %63 : vector<2x32xi1>, vector<2x32xf32>
    %123 = vector.shape_cast %119 : vector<2x1xi1> to vector<2x1xi1>
    %124 = vector.broadcast %123 : vector<2x1xi1> to vector<2x32xi1>
    %125 = arith.select %124, %115, %66 : vector<2x32xi1>, vector<2x32xf32>
    %126 = vector.extract_strided_slice %103 {offsets = [0, 128], sizes = [2, 128], strides = [1, 1]} : vector<2x256xf32> to vector<2x128xf32>
    %127 = vector.extract_strided_slice %126 {offsets = [0, 0], sizes = [2, 32], strides = [1, 1]} : vector<2x128xf32> to vector<2x32xf32>
    %128 = vector.extract_strided_slice %126 {offsets = [0, 32], sizes = [2, 32], strides = [1, 1]} : vector<2x128xf32> to vector<2x32xf32>
    %129 = vector.extract_strided_slice %126 {offsets = [0, 64], sizes = [2, 32], strides = [1, 1]} : vector<2x128xf32> to vector<2x32xf32>
    %cst_28 = arith.constant 2.000000e+00 : f32
    %130 = vector.broadcast %cst_28 : f32 to vector<2x32xf32>
    %131 = arith.mulf %130, %129 : vector<2x32xf32>
    %cst_29 = arith.constant 1.000000e+00 : f32
    %132 = vector.broadcast %cst_29 : f32 to vector<2x32xf32>
    %133 = arith.subf %131, %132 : vector<2x32xf32>
    %134 = vector.extract_strided_slice %126 {offsets = [0, 96], sizes = [2, 32], strides = [1, 1]} : vector<2x128xf32> to vector<2x32xf32>
    %135 = arith.mulf %128, %88 : vector<2x32xf32>
    %136 = arith.mulf %127, %133 : vector<2x32xf32>
    %137 = arith.addf %135, %136 : vector<2x32xf32>
    %138 = math.tanh %137 : vector<2x32xf32>
    %139 = arith.mulf %134, %138 : vector<2x32xf32>
    %c1_i32_30 = arith.constant 1 : i32
    %140 = vector.broadcast %c1_i32_30 : i32 to vector<2x1xi32>
    %141 = arith.cmpi sgt, %0, %140 : vector<2x1xi32>
    %142 = vector.shape_cast %141 : vector<2x1xi1> to vector<2x1xi1>
    %143 = vector.broadcast %142 : vector<2x1xi1> to vector<2x32xi1>
    %144 = arith.select %143, %139, %85 : vector<2x32xi1>, vector<2x32xf32>
    %145 = vector.shape_cast %141 : vector<2x1xi1> to vector<2x1xi1>
    %146 = vector.broadcast %145 : vector<2x1xi1> to vector<2x32xi1>
    %147 = arith.select %146, %137, %88 : vector<2x32xi1>, vector<2x32xf32>
    %cst_31 = arith.constant 0.000000e+00 : f32
    %148 = vector.shape_cast %141 : vector<2x1xi1> to vector<2x1xi1>
    %149 = vector.broadcast %148 : vector<2x1xi1> to vector<2x32xi1>
    %150 = vector.broadcast %cst_31 : f32 to vector<2x32xf32>
    %151 = arith.select %149, %139, %150 : vector<2x32xi1>, vector<2x32xf32>
    %c2_32 = arith.constant 2 : index
    %c0_33 = arith.constant 0 : index
    %152 = vector.load %arg9[%c2_32, %c0_33] : memref<16x32xf32, #tpu.memory_space<vmem>>, vector<2x32xf32>
    tpu.vector_store %arg9[%c2_32, %c0_33], %151 {strides = array<i32>} : memref<16x32xf32, #tpu.memory_space<vmem>>, vector<2x32xf32>,
    %153 = tpu.concatenate %122, %117, %144 in 1 : vector<2x32xf32>, vector<2x32xf32>, vector<2x32xf32> -> vector<2x96xf32>
    %c3 = arith.constant 3 : index
    %c0_34 = arith.constant 0 : index
    %c0_35 = arith.constant 0 : index
    %154 = vector.load %arg1[%c3, %c0_34, %c0_35] : memref<9x2x256xf32, #tpu.memory_space<vmem>>, vector<1x2x256xf32>
    %155 = vector.shape_cast %154 : vector<1x2x256xf32> to vector<2x256xf32>
    %cst_36 = arith.constant dense<0.000000e+00> : vector<2x256xf32>
    %156 = tpu.matmul %153, %1, %cst_36 {dimension_numbers = #tpu.dot_dimension_numbers<[1], [0], [0], [1], [0, 0, 1, 1], [], []>} : vector<2x96xf32>, vector<96x256xf32>, vector<2x256xf32> -> vector<2x256xf32>
    %157 = arith.addf %155, %156 : vector<2x256xf32>
    %158 = arith.negf %157 : vector<2x256xf32>
    %159 = math.exp %158 : vector<2x256xf32>
    %cst_37 = arith.constant 1.000000e+00 : f32
    %160 = vector.broadcast %cst_37 : f32 to vector<2x256xf32>
    %161 = arith.addf %160, %159 : vector<2x256xf32>
    %162 = arith.divf %160, %161 : vector<2x256xf32>
    %163 = vector.extract_strided_slice %162 {offsets = [0, 0], sizes = [2, 128], strides = [1, 1]} : vector<2x256xf32> to vector<2x128xf32>
    %164 = vector.extract_strided_slice %163 {offsets = [0, 0], sizes = [2, 32], strides = [1, 1]} : vector<2x128xf32> to vector<2x32xf32>
    %165 = vector.extract_strided_slice %163 {offsets = [0, 32], sizes = [2, 32], strides = [1, 1]} : vector<2x128xf32> to vector<2x32xf32>
    %166 = vector.extract_strided_slice %163 {offsets = [0, 64], sizes = [2, 32], strides = [1, 1]} : vector<2x128xf32> to vector<2x32xf32>
    %cst_38 = arith.constant 2.000000e+00 : f32
    %167 = vector.broadcast %cst_38 : f32 to vector<2x32xf32>
    %168 = arith.mulf %167, %166 : vector<2x32xf32>
    %cst_39 = arith.constant 1.000000e+00 : f32
    %169 = vector.broadcast %cst_39 : f32 to vector<2x32xf32>
    %170 = arith.subf %168, %169 : vector<2x32xf32>
    %171 = vector.extract_strided_slice %163 {offsets = [0, 96], sizes = [2, 32], strides = [1, 1]} : vector<2x128xf32> to vector<2x32xf32>
    %172 = arith.mulf %165, %125 : vector<2x32xf32>
    %173 = arith.mulf %164, %170 : vector<2x32xf32>
    %174 = arith.addf %172, %173 : vector<2x32xf32>
    %175 = math.tanh %174 : vector<2x32xf32>
    %176 = arith.mulf %171, %175 : vector<2x32xf32>
    %c3_i32 = arith.constant 3 : i32
    %177 = vector.broadcast %c3_i32 : i32 to vector<2x1xi32>
    %178 = arith.cmpi sgt, %0, %177 : vector<2x1xi32>
    %179 = vector.shape_cast %178 : vector<2x1xi1> to vector<2x1xi1>
    %180 = vector.broadcast %179 : vector<2x1xi1> to vector<2x32xi1>
    %181 = arith.select %180, %176, %122 : vector<2x32xi1>, vector<2x32xf32>
    %182 = vector.shape_cast %178 : vector<2x1xi1> to vector<2x1xi1>
    %183 = vector.broadcast %182 : vector<2x1xi1> to vector<2x32xi1>
    %184 = arith.select %183, %174, %125 : vector<2x32xi1>, vector<2x32xf32>
    %185 = vector.extract_strided_slice %162 {offsets = [0, 128], sizes = [2, 128], strides = [1, 1]} : vector<2x256xf32> to vector<2x128xf32>
    %186 = vector.extract_strided_slice %185 {offsets = [0, 0], sizes = [2, 32], strides = [1, 1]} : vector<2x128xf32> to vector<2x32xf32>
    %187 = vector.extract_strided_slice %185 {offsets = [0, 32], sizes = [2, 32], strides = [1, 1]} : vector<2x128xf32> to vector<2x32xf32>
    %188 = vector.extract_strided_slice %185 {offsets = [0, 64], sizes = [2, 32], strides = [1, 1]} : vector<2x128xf32> to vector<2x32xf32>
    %cst_40 = arith.constant 2.000000e+00 : f32
    %189 = vector.broadcast %cst_40 : f32 to vector<2x32xf32>
    %190 = arith.mulf %189, %188 : vector<2x32xf32>
    %cst_41 = arith.constant 1.000000e+00 : f32
    %191 = vector.broadcast %cst_41 : f32 to vector<2x32xf32>
    %192 = arith.subf %190, %191 : vector<2x32xf32>
    %193 = vector.extract_strided_slice %185 {offsets = [0, 96], sizes = [2, 32], strides = [1, 1]} : vector<2x128xf32> to vector<2x32xf32>
    %194 = arith.mulf %187, %147 : vector<2x32xf32>
    %195 = arith.mulf %186, %192 : vector<2x32xf32>
    %196 = arith.addf %194, %195 : vector<2x32xf32>
    %197 = math.tanh %196 : vector<2x32xf32>
    %198 = arith.mulf %193, %197 : vector<2x32xf32>
    %c2_i32_42 = arith.constant 2 : i32
    %199 = vector.broadcast %c2_i32_42 : i32 to vector<2x1xi32>
    %200 = arith.cmpi sgt, %0, %199 : vector<2x1xi32>
    %201 = vector.shape_cast %200 : vector<2x1xi1> to vector<2x1xi1>
    %202 = vector.broadcast %201 : vector<2x1xi1> to vector<2x32xi1>
    %203 = arith.select %202, %198, %144 : vector<2x32xi1>, vector<2x32xf32>
    %204 = vector.shape_cast %200 : vector<2x1xi1> to vector<2x1xi1>
    %205 = vector.broadcast %204 : vector<2x1xi1> to vector<2x32xi1>
    %206 = arith.select %205, %196, %147 : vector<2x32xi1>, vector<2x32xf32>
    %cst_43 = arith.constant 0.000000e+00 : f32
    %207 = vector.shape_cast %200 : vector<2x1xi1> to vector<2x1xi1>
    %208 = vector.broadcast %207 : vector<2x1xi1> to vector<2x32xi1>
    %209 = vector.broadcast %cst_43 : f32 to vector<2x32xf32>
    %210 = arith.select %208, %198, %209 : vector<2x32xi1>, vector<2x32xf32>
    %c4 = arith.constant 4 : index
    %c0_44 = arith.constant 0 : index
    %211 = vector.load %arg9[%c4, %c0_44] : memref<16x32xf32, #tpu.memory_space<vmem>>, vector<2x32xf32>
    tpu.vector_store %arg9[%c4, %c0_44], %210 {strides = array<i32>} : memref<16x32xf32, #tpu.memory_space<vmem>>, vector<2x32xf32>,
    %212 = tpu.concatenate %181, %176, %203 in 1 : vector<2x32xf32>, vector<2x32xf32>, vector<2x32xf32> -> vector<2x96xf32>
    %c4_45 = arith.constant 4 : index
    %c0_46 = arith.constant 0 : index
    %c0_47 = arith.constant 0 : index
    %213 = vector.load %arg1[%c4_45, %c0_46, %c0_47] : memref<9x2x256xf32, #tpu.memory_space<vmem>>, vector<1x2x256xf32>
    %214 = vector.shape_cast %213 : vector<1x2x256xf32> to vector<2x256xf32>
    %cst_48 = arith.constant dense<0.000000e+00> : vector<2x256xf32>
    %215 = tpu.matmul %212, %1, %cst_48 {dimension_numbers = #tpu.dot_dimension_numbers<[1], [0], [0], [1], [0, 0, 1, 1], [], []>} : vector<2x96xf32>, vector<96x256xf32>, vector<2x256xf32> -> vector<2x256xf32>
    %216 = arith.addf %214, %215 : vector<2x256xf32>
    %217 = arith.negf %216 : vector<2x256xf32>
    %218 = math.exp %217 : vector<2x256xf32>
    %cst_49 = arith.constant 1.000000e+00 : f32
    %219 = vector.broadcast %cst_49 : f32 to vector<2x256xf32>
    %220 = arith.addf %219, %218 : vector<2x256xf32>
    %221 = arith.divf %219, %220 : vector<2x256xf32>
    %222 = vector.extract_strided_slice %221 {offsets = [0, 0], sizes = [2, 128], strides = [1, 1]} : vector<2x256xf32> to vector<2x128xf32>
    %223 = vector.extract_strided_slice %222 {offsets = [0, 0], sizes = [2, 32], strides = [1, 1]} : vector<2x128xf32> to vector<2x32xf32>
    %224 = vector.extract_strided_slice %222 {offsets = [0, 32], sizes = [2, 32], strides = [1, 1]} : vector<2x128xf32> to vector<2x32xf32>
    %225 = vector.extract_strided_slice %222 {offsets = [0, 64], sizes = [2, 32], strides = [1, 1]} : vector<2x128xf32> to vector<2x32xf32>
    %cst_50 = arith.constant 2.000000e+00 : f32
    %226 = vector.broadcast %cst_50 : f32 to vector<2x32xf32>
    %227 = arith.mulf %226, %225 : vector<2x32xf32>
    %cst_51 = arith.constant 1.000000e+00 : f32
    %228 = vector.broadcast %cst_51 : f32 to vector<2x32xf32>
    %229 = arith.subf %227, %228 : vector<2x32xf32>
    %230 = vector.extract_strided_slice %222 {offsets = [0, 96], sizes = [2, 32], strides = [1, 1]} : vector<2x128xf32> to vector<2x32xf32>
    %231 = arith.mulf %224, %184 : vector<2x32xf32>
    %232 = arith.mulf %223, %229 : vector<2x32xf32>
    %233 = arith.addf %231, %232 : vector<2x32xf32>
    %234 = math.tanh %233 : vector<2x32xf32>
    %235 = arith.mulf %230, %234 : vector<2x32xf32>
    %c4_i32 = arith.constant 4 : i32
    %236 = vector.broadcast %c4_i32 : i32 to vector<2x1xi32>
    %237 = arith.cmpi sgt, %0, %236 : vector<2x1xi32>
    %238 = vector.shape_cast %237 : vector<2x1xi1> to vector<2x1xi1>
    %239 = vector.broadcast %238 : vector<2x1xi1> to vector<2x32xi1>
    %240 = arith.select %239, %235, %181 : vector<2x32xi1>, vector<2x32xf32>
    %241 = vector.shape_cast %237 : vector<2x1xi1> to vector<2x1xi1>
    %242 = vector.broadcast %241 : vector<2x1xi1> to vector<2x32xi1>
    %243 = arith.select %242, %233, %184 : vector<2x32xi1>, vector<2x32xf32>
    %244 = vector.extract_strided_slice %221 {offsets = [0, 128], sizes = [2, 128], strides = [1, 1]} : vector<2x256xf32> to vector<2x128xf32>
    %245 = vector.extract_strided_slice %244 {offsets = [0, 0], sizes = [2, 32], strides = [1, 1]} : vector<2x128xf32> to vector<2x32xf32>
    %246 = vector.extract_strided_slice %244 {offsets = [0, 32], sizes = [2, 32], strides = [1, 1]} : vector<2x128xf32> to vector<2x32xf32>
    %247 = vector.extract_strided_slice %244 {offsets = [0, 64], sizes = [2, 32], strides = [1, 1]} : vector<2x128xf32> to vector<2x32xf32>
    %cst_52 = arith.constant 2.000000e+00 : f32
    %248 = vector.broadcast %cst_52 : f32 to vector<2x32xf32>
    %249 = arith.mulf %248, %247 : vector<2x32xf32>
    %cst_53 = arith.constant 1.000000e+00 : f32
    %250 = vector.broadcast %cst_53 : f32 to vector<2x32xf32>
    %251 = arith.subf %249, %250 : vector<2x32xf32>
    %252 = vector.extract_strided_slice %244 {offsets = [0, 96], sizes = [2, 32], strides = [1, 1]} : vector<2x128xf32> to vector<2x32xf32>
    %253 = arith.mulf %246, %206 : vector<2x32xf32>
    %254 = arith.mulf %245, %251 : vector<2x32xf32>
    %255 = arith.addf %253, %254 : vector<2x32xf32>
    %256 = math.tanh %255 : vector<2x32xf32>
    %257 = arith.mulf %252, %256 : vector<2x32xf32>
    %c3_i32_54 = arith.constant 3 : i32
    %258 = vector.broadcast %c3_i32_54 : i32 to vector<2x1xi32>
    %259 = arith.cmpi sgt, %0, %258 : vector<2x1xi32>
    %260 = vector.shape_cast %259 : vector<2x1xi1> to vector<2x1xi1>
    %261 = vector.broadcast %260 : vector<2x1xi1> to vector<2x32xi1>
    %262 = arith.select %261, %257, %203 : vector<2x32xi1>, vector<2x32xf32>
    %263 = vector.shape_cast %259 : vector<2x1xi1> to vector<2x1xi1>
    %264 = vector.broadcast %263 : vector<2x1xi1> to vector<2x32xi1>
    %265 = arith.select %264, %255, %206 : vector<2x32xi1>, vector<2x32xf32>
    %cst_55 = arith.constant 0.000000e+00 : f32
    %266 = vector.shape_cast %259 : vector<2x1xi1> to vector<2x1xi1>
    %267 = vector.broadcast %266 : vector<2x1xi1> to vector<2x32xi1>
    %268 = vector.broadcast %cst_55 : f32 to vector<2x32xf32>
    %269 = arith.select %267, %257, %268 : vector<2x32xi1>, vector<2x32xf32>
    %c6 = arith.constant 6 : index
    %c0_56 = arith.constant 0 : index
    %270 = vector.load %arg9[%c6, %c0_56] : memref<16x32xf32, #tpu.memory_space<vmem>>, vector<2x32xf32>
    tpu.vector_store %arg9[%c6, %c0_56], %269 {strides = array<i32>} : memref<16x32xf32, #tpu.memory_space<vmem>>, vector<2x32xf32>,
    %271 = tpu.concatenate %240, %235, %262 in 1 : vector<2x32xf32>, vector<2x32xf32>, vector<2x32xf32> -> vector<2x96xf32>
    %c5 = arith.constant 5 : index
    %c0_57 = arith.constant 0 : index
    %c0_58 = arith.constant 0 : index
    %272 = vector.load %arg1[%c5, %c0_57, %c0_58] : memref<9x2x256xf32, #tpu.memory_space<vmem>>, vector<1x2x256xf32>
    %273 = vector.shape_cast %272 : vector<1x2x256xf32> to vector<2x256xf32>
    %cst_59 = arith.constant dense<0.000000e+00> : vector<2x256xf32>
    %274 = tpu.matmul %271, %1, %cst_59 {dimension_numbers = #tpu.dot_dimension_numbers<[1], [0], [0], [1], [0, 0, 1, 1], [], []>} : vector<2x96xf32>, vector<96x256xf32>, vector<2x256xf32> -> vector<2x256xf32>
    %275 = arith.addf %273, %274 : vector<2x256xf32>
    %276 = arith.negf %275 : vector<2x256xf32>
    %277 = math.exp %276 : vector<2x256xf32>
    %cst_60 = arith.constant 1.000000e+00 : f32
    %278 = vector.broadcast %cst_60 : f32 to vector<2x256xf32>
    %279 = arith.addf %278, %277 : vector<2x256xf32>
    %280 = arith.divf %278, %279 : vector<2x256xf32>
    %281 = vector.extract_strided_slice %280 {offsets = [0, 0], sizes = [2, 128], strides = [1, 1]} : vector<2x256xf32> to vector<2x128xf32>
    %282 = vector.extract_strided_slice %281 {offsets = [0, 0], sizes = [2, 32], strides = [1, 1]} : vector<2x128xf32> to vector<2x32xf32>
    %283 = vector.extract_strided_slice %281 {offsets = [0, 32], sizes = [2, 32], strides = [1, 1]} : vector<2x128xf32> to vector<2x32xf32>
    %284 = vector.extract_strided_slice %281 {offsets = [0, 64], sizes = [2, 32], strides = [1, 1]} : vector<2x128xf32> to vector<2x32xf32>
    %cst_61 = arith.constant 2.000000e+00 : f32
    %285 = vector.broadcast %cst_61 : f32 to vector<2x32xf32>
    %286 = arith.mulf %285, %284 : vector<2x32xf32>
    %cst_62 = arith.constant 1.000000e+00 : f32
    %287 = vector.broadcast %cst_62 : f32 to vector<2x32xf32>
    %288 = arith.subf %286, %287 : vector<2x32xf32>
    %289 = vector.extract_strided_slice %281 {offsets = [0, 96], sizes = [2, 32], strides = [1, 1]} : vector<2x128xf32> to vector<2x32xf32>
    %290 = arith.mulf %283, %243 : vector<2x32xf32>
    %291 = arith.mulf %282, %288 : vector<2x32xf32>
    %292 = arith.addf %290, %291 : vector<2x32xf32>
    %293 = math.tanh %292 : vector<2x32xf32>
    %294 = arith.mulf %289, %293 : vector<2x32xf32>
    %c5_i32 = arith.constant 5 : i32
    %295 = vector.broadcast %c5_i32 : i32 to vector<2x1xi32>
    %296 = arith.cmpi sgt, %0, %295 : vector<2x1xi32>
    %297 = vector.shape_cast %296 : vector<2x1xi1> to vector<2x1xi1>
    %298 = vector.broadcast %297 : vector<2x1xi1> to vector<2x32xi1>
    %299 = arith.select %298, %294, %240 : vector<2x32xi1>, vector<2x32xf32>
    %300 = vector.shape_cast %296 : vector<2x1xi1> to vector<2x1xi1>
    %301 = vector.broadcast %300 : vector<2x1xi1> to vector<2x32xi1>
    %302 = arith.select %301, %292, %243 : vector<2x32xi1>, vector<2x32xf32>
    %303 = vector.extract_strided_slice %280 {offsets = [0, 128], sizes = [2, 128], strides = [1, 1]} : vector<2x256xf32> to vector<2x128xf32>
    %304 = vector.extract_strided_slice %303 {offsets = [0, 0], sizes = [2, 32], strides = [1, 1]} : vector<2x128xf32> to vector<2x32xf32>
    %305 = vector.extract_strided_slice %303 {offsets = [0, 32], sizes = [2, 32], strides = [1, 1]} : vector<2x128xf32> to vector<2x32xf32>
    %306 = vector.extract_strided_slice %303 {offsets = [0, 64], sizes = [2, 32], strides = [1, 1]} : vector<2x128xf32> to vector<2x32xf32>
    %cst_63 = arith.constant 2.000000e+00 : f32
    %307 = vector.broadcast %cst_63 : f32 to vector<2x32xf32>
    %308 = arith.mulf %307, %306 : vector<2x32xf32>
    %cst_64 = arith.constant 1.000000e+00 : f32
    %309 = vector.broadcast %cst_64 : f32 to vector<2x32xf32>
    %310 = arith.subf %308, %309 : vector<2x32xf32>
    %311 = vector.extract_strided_slice %303 {offsets = [0, 96], sizes = [2, 32], strides = [1, 1]} : vector<2x128xf32> to vector<2x32xf32>
    %312 = arith.mulf %305, %265 : vector<2x32xf32>
    %313 = arith.mulf %304, %310 : vector<2x32xf32>
    %314 = arith.addf %312, %313 : vector<2x32xf32>
    %315 = math.tanh %314 : vector<2x32xf32>
    %316 = arith.mulf %311, %315 : vector<2x32xf32>
    %c4_i32_65 = arith.constant 4 : i32
    %317 = vector.broadcast %c4_i32_65 : i32 to vector<2x1xi32>
    %318 = arith.cmpi sgt, %0, %317 : vector<2x1xi32>
    %319 = vector.shape_cast %318 : vector<2x1xi1> to vector<2x1xi1>
    %320 = vector.broadcast %319 : vector<2x1xi1> to vector<2x32xi1>
    %321 = arith.select %320, %316, %262 : vector<2x32xi1>, vector<2x32xf32>
    %322 = vector.shape_cast %318 : vector<2x1xi1> to vector<2x1xi1>
    %323 = vector.broadcast %322 : vector<2x1xi1> to vector<2x32xi1>
    %324 = arith.select %323, %314, %265 : vector<2x32xi1>, vector<2x32xf32>
    %cst_66 = arith.constant 0.000000e+00 : f32
    %325 = vector.shape_cast %318 : vector<2x1xi1> to vector<2x1xi1>
    %326 = vector.broadcast %325 : vector<2x1xi1> to vector<2x32xi1>
    %327 = vector.broadcast %cst_66 : f32 to vector<2x32xf32>
    %328 = arith.select %326, %316, %327 : vector<2x32xi1>, vector<2x32xf32>
    %c8 = arith.constant 8 : index
    %c0_67 = arith.constant 0 : index
    %329 = vector.load %arg9[%c8, %c0_67] : memref<16x32xf32, #tpu.memory_space<vmem>>, vector<2x32xf32>
    tpu.vector_store %arg9[%c8, %c0_67], %328 {strides = array<i32>} : memref<16x32xf32, #tpu.memory_space<vmem>>, vector<2x32xf32>,
    %330 = tpu.concatenate %299, %294, %321 in 1 : vector<2x32xf32>, vector<2x32xf32>, vector<2x32xf32> -> vector<2x96xf32>
    %c6_68 = arith.constant 6 : index
    %c0_69 = arith.constant 0 : index
    %c0_70 = arith.constant 0 : index
    %331 = vector.load %arg1[%c6_68, %c0_69, %c0_70] : memref<9x2x256xf32, #tpu.memory_space<vmem>>, vector<1x2x256xf32>
    %332 = vector.shape_cast %331 : vector<1x2x256xf32> to vector<2x256xf32>
    %cst_71 = arith.constant dense<0.000000e+00> : vector<2x256xf32>
    %333 = tpu.matmul %330, %1, %cst_71 {dimension_numbers = #tpu.dot_dimension_numbers<[1], [0], [0], [1], [0, 0, 1, 1], [], []>} : vector<2x96xf32>, vector<96x256xf32>, vector<2x256xf32> -> vector<2x256xf32>
    %334 = arith.addf %332, %333 : vector<2x256xf32>
    %335 = arith.negf %334 : vector<2x256xf32>
    %336 = math.exp %335 : vector<2x256xf32>
    %cst_72 = arith.constant 1.000000e+00 : f32
    %337 = vector.broadcast %cst_72 : f32 to vector<2x256xf32>
    %338 = arith.addf %337, %336 : vector<2x256xf32>
    %339 = arith.divf %337, %338 : vector<2x256xf32>
    %340 = vector.extract_strided_slice %339 {offsets = [0, 0], sizes = [2, 128], strides = [1, 1]} : vector<2x256xf32> to vector<2x128xf32>
    %341 = vector.extract_strided_slice %340 {offsets = [0, 0], sizes = [2, 32], strides = [1, 1]} : vector<2x128xf32> to vector<2x32xf32>
    %342 = vector.extract_strided_slice %340 {offsets = [0, 32], sizes = [2, 32], strides = [1, 1]} : vector<2x128xf32> to vector<2x32xf32>
    %343 = vector.extract_strided_slice %340 {offsets = [0, 64], sizes = [2, 32], strides = [1, 1]} : vector<2x128xf32> to vector<2x32xf32>
    %cst_73 = arith.constant 2.000000e+00 : f32
    %344 = vector.broadcast %cst_73 : f32 to vector<2x32xf32>
    %345 = arith.mulf %344, %343 : vector<2x32xf32>
    %cst_74 = arith.constant 1.000000e+00 : f32
    %346 = vector.broadcast %cst_74 : f32 to vector<2x32xf32>
    %347 = arith.subf %345, %346 : vector<2x32xf32>
    %348 = vector.extract_strided_slice %340 {offsets = [0, 96], sizes = [2, 32], strides = [1, 1]} : vector<2x128xf32> to vector<2x32xf32>
    %349 = arith.mulf %342, %302 : vector<2x32xf32>
    %350 = arith.mulf %341, %347 : vector<2x32xf32>
    %351 = arith.addf %349, %350 : vector<2x32xf32>
    %352 = math.tanh %351 : vector<2x32xf32>
    %353 = arith.mulf %348, %352 : vector<2x32xf32>
    %c6_i32 = arith.constant 6 : i32
    %354 = vector.broadcast %c6_i32 : i32 to vector<2x1xi32>
    %355 = arith.cmpi sgt, %0, %354 : vector<2x1xi32>
    %356 = vector.shape_cast %355 : vector<2x1xi1> to vector<2x1xi1>
    %357 = vector.broadcast %356 : vector<2x1xi1> to vector<2x32xi1>
    %358 = arith.select %357, %353, %299 : vector<2x32xi1>, vector<2x32xf32>
    %359 = vector.shape_cast %355 : vector<2x1xi1> to vector<2x1xi1>
    %360 = vector.broadcast %359 : vector<2x1xi1> to vector<2x32xi1>
    %361 = arith.select %360, %351, %302 : vector<2x32xi1>, vector<2x32xf32>
    %362 = vector.extract_strided_slice %339 {offsets = [0, 128], sizes = [2, 128], strides = [1, 1]} : vector<2x256xf32> to vector<2x128xf32>
    %363 = vector.extract_strided_slice %362 {offsets = [0, 0], sizes = [2, 32], strides = [1, 1]} : vector<2x128xf32> to vector<2x32xf32>
    %364 = vector.extract_strided_slice %362 {offsets = [0, 32], sizes = [2, 32], strides = [1, 1]} : vector<2x128xf32> to vector<2x32xf32>
    %365 = vector.extract_strided_slice %362 {offsets = [0, 64], sizes = [2, 32], strides = [1, 1]} : vector<2x128xf32> to vector<2x32xf32>
    %cst_75 = arith.constant 2.000000e+00 : f32
    %366 = vector.broadcast %cst_75 : f32 to vector<2x32xf32>
    %367 = arith.mulf %366, %365 : vector<2x32xf32>
    %cst_76 = arith.constant 1.000000e+00 : f32
    %368 = vector.broadcast %cst_76 : f32 to vector<2x32xf32>
    %369 = arith.subf %367, %368 : vector<2x32xf32>
    %370 = vector.extract_strided_slice %362 {offsets = [0, 96], sizes = [2, 32], strides = [1, 1]} : vector<2x128xf32> to vector<2x32xf32>
    %371 = arith.mulf %364, %324 : vector<2x32xf32>
    %372 = arith.mulf %363, %369 : vector<2x32xf32>
    %373 = arith.addf %371, %372 : vector<2x32xf32>
    %374 = math.tanh %373 : vector<2x32xf32>
    %375 = arith.mulf %370, %374 : vector<2x32xf32>
    %c5_i32_77 = arith.constant 5 : i32
    %376 = vector.broadcast %c5_i32_77 : i32 to vector<2x1xi32>
    %377 = arith.cmpi sgt, %0, %376 : vector<2x1xi32>
    %378 = vector.shape_cast %377 : vector<2x1xi1> to vector<2x1xi1>
    %379 = vector.broadcast %378 : vector<2x1xi1> to vector<2x32xi1>
    %380 = arith.select %379, %375, %321 : vector<2x32xi1>, vector<2x32xf32>
    %381 = vector.shape_cast %377 : vector<2x1xi1> to vector<2x1xi1>
    %382 = vector.broadcast %381 : vector<2x1xi1> to vector<2x32xi1>
    %383 = arith.select %382, %373, %324 : vector<2x32xi1>, vector<2x32xf32>
    %cst_78 = arith.constant 0.000000e+00 : f32
    %384 = vector.shape_cast %377 : vector<2x1xi1> to vector<2x1xi1>
    %385 = vector.broadcast %384 : vector<2x1xi1> to vector<2x32xi1>
    %386 = vector.broadcast %cst_78 : f32 to vector<2x32xf32>
    %387 = arith.select %385, %375, %386 : vector<2x32xi1>, vector<2x32xf32>
    %c10 = arith.constant 10 : index
    %c0_79 = arith.constant 0 : index
    %388 = vector.load %arg9[%c10, %c0_79] : memref<16x32xf32, #tpu.memory_space<vmem>>, vector<2x32xf32>
    tpu.vector_store %arg9[%c10, %c0_79], %387 {strides = array<i32>} : memref<16x32xf32, #tpu.memory_space<vmem>>, vector<2x32xf32>,
    %389 = tpu.concatenate %358, %353, %380 in 1 : vector<2x32xf32>, vector<2x32xf32>, vector<2x32xf32> -> vector<2x96xf32>
    %c7 = arith.constant 7 : index
    %c0_80 = arith.constant 0 : index
    %c0_81 = arith.constant 0 : index
    %390 = vector.load %arg1[%c7, %c0_80, %c0_81] : memref<9x2x256xf32, #tpu.memory_space<vmem>>, vector<1x2x256xf32>
    %391 = vector.shape_cast %390 : vector<1x2x256xf32> to vector<2x256xf32>
    %cst_82 = arith.constant dense<0.000000e+00> : vector<2x256xf32>
    %392 = tpu.matmul %389, %1, %cst_82 {dimension_numbers = #tpu.dot_dimension_numbers<[1], [0], [0], [1], [0, 0, 1, 1], [], []>} : vector<2x96xf32>, vector<96x256xf32>, vector<2x256xf32> -> vector<2x256xf32>
    %393 = arith.addf %391, %392 : vector<2x256xf32>
    %394 = arith.negf %393 : vector<2x256xf32>
    %395 = math.exp %394 : vector<2x256xf32>
    %cst_83 = arith.constant 1.000000e+00 : f32
    %396 = vector.broadcast %cst_83 : f32 to vector<2x256xf32>
    %397 = arith.addf %396, %395 : vector<2x256xf32>
    %398 = arith.divf %396, %397 : vector<2x256xf32>
    %399 = vector.extract_strided_slice %398 {offsets = [0, 0], sizes = [2, 128], strides = [1, 1]} : vector<2x256xf32> to vector<2x128xf32>
    %400 = vector.extract_strided_slice %399 {offsets = [0, 0], sizes = [2, 32], strides = [1, 1]} : vector<2x128xf32> to vector<2x32xf32>
    %401 = vector.extract_strided_slice %399 {offsets = [0, 32], sizes = [2, 32], strides = [1, 1]} : vector<2x128xf32> to vector<2x32xf32>
    %402 = vector.extract_strided_slice %399 {offsets = [0, 64], sizes = [2, 32], strides = [1, 1]} : vector<2x128xf32> to vector<2x32xf32>
    %cst_84 = arith.constant 2.000000e+00 : f32
    %403 = vector.broadcast %cst_84 : f32 to vector<2x32xf32>
    %404 = arith.mulf %403, %402 : vector<2x32xf32>
    %cst_85 = arith.constant 1.000000e+00 : f32
    %405 = vector.broadcast %cst_85 : f32 to vector<2x32xf32>
    %406 = arith.subf %404, %405 : vector<2x32xf32>
    %407 = vector.extract_strided_slice %399 {offsets = [0, 96], sizes = [2, 32], strides = [1, 1]} : vector<2x128xf32> to vector<2x32xf32>
    %408 = arith.mulf %401, %361 : vector<2x32xf32>
    %409 = arith.mulf %400, %406 : vector<2x32xf32>
    %410 = arith.addf %408, %409 : vector<2x32xf32>
    %411 = math.tanh %410 : vector<2x32xf32>
    %412 = arith.mulf %407, %411 : vector<2x32xf32>
    %c7_i32 = arith.constant 7 : i32
    %413 = vector.broadcast %c7_i32 : i32 to vector<2x1xi32>
    %414 = arith.cmpi sgt, %0, %413 : vector<2x1xi32>
    %415 = vector.shape_cast %414 : vector<2x1xi1> to vector<2x1xi1>
    %416 = vector.broadcast %415 : vector<2x1xi1> to vector<2x32xi1>
    %417 = arith.select %416, %412, %358 : vector<2x32xi1>, vector<2x32xf32>
    %418 = vector.shape_cast %414 : vector<2x1xi1> to vector<2x1xi1>
    %419 = vector.broadcast %418 : vector<2x1xi1> to vector<2x32xi1>
    %420 = arith.select %419, %410, %361 : vector<2x32xi1>, vector<2x32xf32>
    %421 = vector.extract_strided_slice %398 {offsets = [0, 128], sizes = [2, 128], strides = [1, 1]} : vector<2x256xf32> to vector<2x128xf32>
    %422 = vector.extract_strided_slice %421 {offsets = [0, 0], sizes = [2, 32], strides = [1, 1]} : vector<2x128xf32> to vector<2x32xf32>
    %423 = vector.extract_strided_slice %421 {offsets = [0, 32], sizes = [2, 32], strides = [1, 1]} : vector<2x128xf32> to vector<2x32xf32>
    %424 = vector.extract_strided_slice %421 {offsets = [0, 64], sizes = [2, 32], strides = [1, 1]} : vector<2x128xf32> to vector<2x32xf32>
    %cst_86 = arith.constant 2.000000e+00 : f32
    %425 = vector.broadcast %cst_86 : f32 to vector<2x32xf32>
    %426 = arith.mulf %425, %424 : vector<2x32xf32>
    %cst_87 = arith.constant 1.000000e+00 : f32
    %427 = vector.broadcast %cst_87 : f32 to vector<2x32xf32>
    %428 = arith.subf %426, %427 : vector<2x32xf32>
    %429 = vector.extract_strided_slice %421 {offsets = [0, 96], sizes = [2, 32], strides = [1, 1]} : vector<2x128xf32> to vector<2x32xf32>
    %430 = arith.mulf %423, %383 : vector<2x32xf32>
    %431 = arith.mulf %422, %428 : vector<2x32xf32>
    %432 = arith.addf %430, %431 : vector<2x32xf32>
    %433 = math.tanh %432 : vector<2x32xf32>
    %434 = arith.mulf %429, %433 : vector<2x32xf32>
    %c6_i32_88 = arith.constant 6 : i32
    %435 = vector.broadcast %c6_i32_88 : i32 to vector<2x1xi32>
    %436 = arith.cmpi sgt, %0, %435 : vector<2x1xi32>
    %437 = vector.shape_cast %436 : vector<2x1xi1> to vector<2x1xi1>
    %438 = vector.broadcast %437 : vector<2x1xi1> to vector<2x32xi1>
    %439 = arith.select %438, %434, %380 : vector<2x32xi1>, vector<2x32xf32>
    %440 = vector.shape_cast %436 : vector<2x1xi1> to vector<2x1xi1>
    %441 = vector.broadcast %440 : vector<2x1xi1> to vector<2x32xi1>
    %442 = arith.select %441, %432, %383 : vector<2x32xi1>, vector<2x32xf32>
    %cst_89 = arith.constant 0.000000e+00 : f32
    %443 = vector.shape_cast %436 : vector<2x1xi1> to vector<2x1xi1>
    %444 = vector.broadcast %443 : vector<2x1xi1> to vector<2x32xi1>
    %445 = vector.broadcast %cst_89 : f32 to vector<2x32xf32>
    %446 = arith.select %444, %434, %445 : vector<2x32xi1>, vector<2x32xf32>
    %c12 = arith.constant 12 : index
    %c0_90 = arith.constant 0 : index
    %447 = vector.load %arg9[%c12, %c0_90] : memref<16x32xf32, #tpu.memory_space<vmem>>, vector<2x32xf32>
    tpu.vector_store %arg9[%c12, %c0_90], %446 {strides = array<i32>} : memref<16x32xf32, #tpu.memory_space<vmem>>, vector<2x32xf32>,
    %448 = tpu.concatenate %417, %412, %439 in 1 : vector<2x32xf32>, vector<2x32xf32>, vector<2x32xf32> -> vector<2x96xf32>
    %c8_91 = arith.constant 8 : index
    %c0_92 = arith.constant 0 : index
    %c0_93 = arith.constant 0 : index
    %449 = vector.load %arg1[%c8_91, %c0_92, %c0_93] : memref<9x2x256xf32, #tpu.memory_space<vmem>>, vector<1x2x256xf32>
    %450 = vector.shape_cast %449 : vector<1x2x256xf32> to vector<2x256xf32>
    %cst_94 = arith.constant dense<0.000000e+00> : vector<2x256xf32>
    %451 = tpu.matmul %448, %1, %cst_94 {dimension_numbers = #tpu.dot_dimension_numbers<[1], [0], [0], [1], [0, 0, 1, 1], [], []>} : vector<2x96xf32>, vector<96x256xf32>, vector<2x256xf32> -> vector<2x256xf32>
    %452 = arith.addf %450, %451 : vector<2x256xf32>
    %453 = arith.negf %452 : vector<2x256xf32>
    %454 = math.exp %453 : vector<2x256xf32>
    %cst_95 = arith.constant 1.000000e+00 : f32
    %455 = vector.broadcast %cst_95 : f32 to vector<2x256xf32>
    %456 = arith.addf %455, %454 : vector<2x256xf32>
    %457 = arith.divf %455, %456 : vector<2x256xf32>
    %458 = vector.extract_strided_slice %457 {offsets = [0, 128], sizes = [2, 128], strides = [1, 1]} : vector<2x256xf32> to vector<2x128xf32>
    %459 = vector.extract_strided_slice %458 {offsets = [0, 0], sizes = [2, 32], strides = [1, 1]} : vector<2x128xf32> to vector<2x32xf32>
    %460 = vector.extract_strided_slice %458 {offsets = [0, 32], sizes = [2, 32], strides = [1, 1]} : vector<2x128xf32> to vector<2x32xf32>
    %461 = vector.extract_strided_slice %458 {offsets = [0, 64], sizes = [2, 32], strides = [1, 1]} : vector<2x128xf32> to vector<2x32xf32>
    %cst_96 = arith.constant 2.000000e+00 : f32
    %462 = vector.broadcast %cst_96 : f32 to vector<2x32xf32>
    %463 = arith.mulf %462, %461 : vector<2x32xf32>
    %cst_97 = arith.constant 1.000000e+00 : f32
    %464 = vector.broadcast %cst_97 : f32 to vector<2x32xf32>
    %465 = arith.subf %463, %464 : vector<2x32xf32>
    %466 = vector.extract_strided_slice %458 {offsets = [0, 96], sizes = [2, 32], strides = [1, 1]} : vector<2x128xf32> to vector<2x32xf32>
    %467 = arith.mulf %460, %442 : vector<2x32xf32>
    %468 = arith.mulf %459, %465 : vector<2x32xf32>
    %469 = arith.addf %467, %468 : vector<2x32xf32>
    %470 = math.tanh %469 : vector<2x32xf32>
    %471 = arith.mulf %466, %470 : vector<2x32xf32>
    %c7_i32_98 = arith.constant 7 : i32
    %472 = vector.broadcast %c7_i32_98 : i32 to vector<2x1xi32>
    %473 = arith.cmpi sgt, %0, %472 : vector<2x1xi32>
    %474 = vector.shape_cast %473 : vector<2x1xi1> to vector<2x1xi1>
    %475 = vector.broadcast %474 : vector<2x1xi1> to vector<2x32xi1>
    %476 = arith.select %475, %471, %439 : vector<2x32xi1>, vector<2x32xf32>
    %477 = vector.shape_cast %473 : vector<2x1xi1> to vector<2x1xi1>
    %478 = vector.broadcast %477 : vector<2x1xi1> to vector<2x32xi1>
    %479 = arith.select %478, %469, %442 : vector<2x32xi1>, vector<2x32xf32>
    %cst_99 = arith.constant 0.000000e+00 : f32
    %480 = vector.shape_cast %473 : vector<2x1xi1> to vector<2x1xi1>
    %481 = vector.broadcast %480 : vector<2x1xi1> to vector<2x32xi1>
    %482 = vector.broadcast %cst_99 : f32 to vector<2x32xf32>
    %483 = arith.select %481, %471, %482 : vector<2x32xi1>, vector<2x32xf32>
    %c14 = arith.constant 14 : index
    %c0_100 = arith.constant 0 : index
    %484 = vector.load %arg9[%c14, %c0_100] : memref<16x32xf32, #tpu.memory_space<vmem>>, vector<2x32xf32>
    tpu.vector_store %arg9[%c14, %c0_100], %483 {strides = array<i32>} : memref<16x32xf32, #tpu.memory_space<vmem>>, vector<2x32xf32>,
    %c0_101 = arith.constant 0 : index
    %c0_102 = arith.constant 0 : index
    %485 = vector.load %arg9[%c0_101, %c0_102] : memref<16x32xf32, #tpu.memory_space<vmem>>, vector<16x32xf32>
    %c0_103 = arith.constant 0 : index
    %c0_104 = arith.constant 0 : index
    %486 = vector.load %arg4[%c0_103, %c0_104] : memref<32x128xf32, #tpu.memory_space<vmem>>, vector<32x128xf32>
    %cst_105 = arith.constant dense<0.000000e+00> : vector<16x128xf32>
    %487 = tpu.matmul %485, %486, %cst_105 {dimension_numbers = #tpu.dot_dimension_numbers<[1], [0], [0], [1], [0, 0, 1, 1], [], []>} : vector<16x32xf32>, vector<32x128xf32>, vector<16x128xf32> -> vector<16x128xf32>
    %c0_106 = arith.constant 0 : index
    %c0_107 = arith.constant 0 : index
    %488 = vector.load %arg5[%c0_106, %c0_107] : memref<1x128xf32, #tpu.memory_space<vmem>>, vector<1x128xf32>
    %489 = vector.broadcast %488 : vector<1x128xf32> to vector<16x128xf32>
    %490 = arith.addf %487, %489 : vector<16x128xf32>
    %c0_108 = arith.constant 0 : index
    %c0_109 = arith.constant 0 : index
    %491 = vector.load %arg6[%c0_108, %c0_109] : memref<16x128xf32, #tpu.memory_space<vmem>>, vector<16x128xf32>
    tpu.vector_store %arg6[%c0_108, %c0_109], %490 {strides = array<i32>} : memref<16x128xf32, #tpu.memory_space<vmem>>, vector<16x128xf32>,
    %c0_110 = arith.constant 0 : index
    %c0_111 = arith.constant 0 : index
    %c0_112 = arith.constant 0 : index
    %492 = vector.load %arg7[%c0_110, %c0_111, %c0_112] : memref<2x2x32xf32, #tpu.memory_space<vmem>>, vector<1x2x32xf32>
    %493 = vector.shape_cast %492 : vector<1x2x32xf32> to vector<2x32xf32>
    %494 = vector.shape_cast %417 : vector<2x32xf32> to vector<1x2x32xf32>
    tpu.vector_store %arg7[%c0_110, %c0_111, %c0_112], %494 {strides = array<i32>} : memref<2x2x32xf32, #tpu.memory_space<vmem>>, vector<1x2x32xf32>,
    %c0_113 = arith.constant 0 : index
    %c0_114 = arith.constant 0 : index
    %c0_115 = arith.constant 0 : index
    %495 = vector.load %arg8[%c0_113, %c0_114, %c0_115] : memref<2x2x32xf32, #tpu.memory_space<vmem>>, vector<1x2x32xf32>
    %496 = vector.shape_cast %495 : vector<1x2x32xf32> to vector<2x32xf32>
    %497 = vector.shape_cast %420 : vector<2x32xf32> to vector<1x2x32xf32>
    tpu.vector_store %arg8[%c0_113, %c0_114, %c0_115], %497 {strides = array<i32>} : memref<2x2x32xf32, #tpu.memory_space<vmem>>, vector<1x2x32xf32>,
    %c1_116 = arith.constant 1 : index
    %c0_117 = arith.constant 0 : index
    %c0_118 = arith.constant 0 : index
    %498 = vector.load %arg7[%c1_116, %c0_117, %c0_118] : memref<2x2x32xf32, #tpu.memory_space<vmem>>, vector<1x2x32xf32>
    %499 = vector.shape_cast %498 : vector<1x2x32xf32> to vector<2x32xf32>
    %500 = vector.shape_cast %476 : vector<2x32xf32> to vector<1x2x32xf32>
    tpu.vector_store %arg7[%c1_116, %c0_117, %c0_118], %500 {strides = array<i32>} : memref<2x2x32xf32, #tpu.memory_space<vmem>>, vector<1x2x32xf32>,
    %c1_119 = arith.constant 1 : index
    %c0_120 = arith.constant 0 : index
    %c0_121 = arith.constant 0 : index
    %501 = vector.load %arg8[%c1_119, %c0_120, %c0_121] : memref<2x2x32xf32, #tpu.memory_space<vmem>>, vector<1x2x32xf32>
    %502 = vector.shape_cast %501 : vector<1x2x32xf32> to vector<2x32xf32>
    %503 = vector.shape_cast %479 : vector<2x32xf32> to vector<1x2x32xf32>
    tpu.vector_store %arg8[%c1_119, %c0_120, %c0_121], %503 {strides = array<i32>} : memref<2x2x32xf32, #tpu.memory_space<vmem>>, vector<1x2x32xf32>,
    return
  }
  func.func @transform_0(%arg0: i32) -> (i32, i32, i32) {
    %c0_i32 = arith.constant 0 : i32
    %c0_i32_0 = arith.constant 0 : i32
    %c0_i32_1 = arith.constant 0 : i32
    %c0_i32_2 = arith.constant 0 : i32
    return %c0_i32, %c0_i32_0, %c0_i32_1 : i32, i32, i32
  }
  func.func @transform_1(%arg0: i32) -> (i32, i32) {
    %c0_i32 = arith.constant 0 : i32
    %c0_i32_0 = arith.constant 0 : i32
    %c0_i32_1 = arith.constant 0 : i32
    return %c0_i32, %c0_i32_0 : i32, i32
  }
  func.func @transform_2(%arg0: i32) -> (i32, i32) {
    %c0_i32 = arith.constant 0 : i32
    %c0_i32_0 = arith.constant 0 : i32
    %c0_i32_1 = arith.constant 0 : i32
    return %c0_i32, %c0_i32_0 : i32, i32
  }
  func.func @transform_3(%arg0: i32) -> (i32, i32) {
    %c0_i32 = arith.constant 0 : i32
    %c0_i32_0 = arith.constant 0 : i32
    %c0_i32_1 = arith.constant 0 : i32
    return %c0_i32, %c0_i32_0 : i32, i32
  }
  func.func @transform_4(%arg0: i32) -> (i32, i32) {
    %c0_i32 = arith.constant 0 : i32
    %c0_i32_0 = arith.constant 0 : i32
    %c0_i32_1 = arith.constant 0 : i32
    return %c0_i32, %c0_i32_0 : i32, i32
  }
  func.func @transform_5(%arg0: i32) -> (i32, i32) {
    %c0_i32 = arith.constant 0 : i32
    %c0_i32_0 = arith.constant 0 : i32
    %c0_i32_1 = arith.constant 0 : i32
    return %c0_i32, %c0_i32_0 : i32, i32
  }
  func.func @transform_6(%arg0: i32) -> (i32, i32, i32) {
    %c0_i32 = arith.constant 0 : i32
    %c0_i32_0 = arith.constant 0 : i32
    %c0_i32_1 = arith.constant 0 : i32
    %c0_i32_2 = arith.constant 0 : i32
    return %c0_i32, %c0_i32_0, %c0_i32_1 : i32, i32, i32
  }
  func.func @transform_7(%arg0: i32) -> (i32, i32, i32) {
    %c0_i32 = arith.constant 0 : i32
    %c0_i32_0 = arith.constant 0 : i32
    %c0_i32_1 = arith.constant 0 : i32
    %c0_i32_2 = arith.constant 0 : i32
    return %c0_i32, %c0_i32_0, %c0_i32_1 : i32, i32, i32
  }
}

</mosaic_0001>

<bundles_post_ra>
// kernel: tpu_custom_call.1
= control target key start
LH: loop header
LB: loop body
LE: loop exit
PB: predicated region body
PF: predicated region fallthrough
CT: control target
= control target key end

     0   :  { %13 = vsyncpa [#allocation4], 0  ;;  %s3014_s0 = inlined_call_operand.hbm [shape: f32[9,2,256], index: 0, kind: input, shape index: {}]   ;;  %s3015_s1 = inlined_call_operand.vmem [shape: s32[2,1], index: 1, kind: input, shape index: {}]   ;;  %s3016_s2 = inlined_call_operand.hbm [shape: f32[96,256], index: 2, kind: input, shape index: {}]   ;;  %s3017_s3 = inlined_call_operand.hbm [shape: f32[32,128], index: 3, kind: input, shape index: {}]   ;;  %s3018_s4 = inlined_call_operand.vmem [shape: f32[1,128], index: 4, kind: input, shape index: {}]   ;;  %s3019_s5 = inlined_call_operand.hbm [shape: f32[16,128], index: 5, kind: output, shape index: {0}]   ;;  %s3020_s6 = inlined_call_operand.hbm [shape: f32[2,2,32], index: 6, kind: output, shape index: {1}]   ;;  %s3021_s7 = inlined_call_operand.hbm [shape: f32[2,2,32], index: 7, kind: output, shape index: {2}]  }
   0x1   :  { %14 = vsyncpa [#allocation7], 0 }
   0x2   :  { %15 = vsyncpa [#allocation5], 0 }
   0x3   :  { %16 = vsyncpa [#allocation11], 0  ;;  %s2341_s24 = smov [#allocation6]   ;;  %s2201_s28 = scalar_lea.hbm %s3016_s2, 3072 }
   0x4   :  { %s36_s25 = sshll.u32 %s2341_s24, 4  ;;  %p2202_p0 = scmp.ne.s32.totalorder %s3016_s2, %s2201_s28  ;;  %s37_s25 = int_to_ptr.vmem [resolvable:$true] %s36_s25 }
   0x5   :  { %p2205_p1 = scmp.lt.u32.totalorder %s2201_s28, %s3016_s2 }
   0x7   :  { %p2207_p2 = pnand %p2205_p1, %p2202_p0 }
   0x9   :  { %2210 = shalt.err (!%p2207_p2)
}
   0xa   :  { %s2211_s10 = scalar_lea.vmem %s37_s25, 3072  ;;  %p2216_p4 = scmp.lt.s32.totalorder %s37_s25, %s37_s25 }
   0xb   :  { %p2212_p3 = scmp.ne.s32.totalorder %s37_s25, %s2211_s10  ;;  %p2217_p5 = scmp.lt.s32.totalorder %s2211_s10, %s2211_s10 }
   0xd   :  { %p2218_p6 = por %p2217_p5, %p2216_p4 }
   0xf   :  { %p2219_p7 = pnand %p2218_p6, %p2212_p3 }
  0x11   :  { %2222 = shalt.err (!%p2219_p7)
}
  0x12   :  { %s2342_s11 = smov 256   ;;  %s2343_s12 = smov 16  }
  0x13   :  { %42 = dma.hbm_to_vmem [thread:$0]  %s3016_s2, 3072, %s37_s25, [#allocation7], %s2342_s11, %s2342_s11, %s2343_s12  }
  0x14   :  { %s2344_s15 = smov [#allocation3]   ;;  %s2223_s19 = scalar_lea.hbm %s3014_s0, 576 }
  0x15   :  { %s22_s16 = sshll.u32 %s2344_s15, 4  ;;  %p2224_p8 = scmp.ne.s32.totalorder %s3014_s0, %s2223_s19  ;;  %s23_s16 = int_to_ptr.vmem [resolvable:$true] %s22_s16 }
  0x16   :  { %p2227_p9 = scmp.lt.u32.totalorder %s2223_s19, %s3014_s0 }
  0x18   :  { %p2229_p10 = pnand %p2227_p9, %p2224_p8 }
  0x1a   :  { %2232 = shalt.err (!%p2229_p10)
}
  0x1b   :  { %s2233_s24 = scalar_lea.vmem %s23_s16, 576  ;;  %p2238_p12 = scmp.lt.s32.totalorder %s23_s16, %s23_s16 }
  0x1c   :  { %p2234_p11 = scmp.ne.s32.totalorder %s23_s16, %s2233_s24  ;;  %p2239_p13 = scmp.lt.s32.totalorder %s2233_s24, %s2233_s24 }
  0x1e   :  { %p2240_p0 = por %p2239_p13, %p2238_p12 }
  0x20   :  { %p2241_p1 = pnand %p2240_p0, %p2234_p11 }
  0x22   :  { %2244 = shalt.err (!%p2241_p1)
}
  0x23   :  { %s2345_s2 = smov 64   ;;  %s2346_s25 = smov 4  }
  0x24   :  { %28 = dma.hbm_to_vmem [thread:$0]  %s3014_s0, 576, %s23_s16, [#allocation4], %s2345_s2, %s2345_s2, %s2346_s25  }
  0x25   :  { %s2347_s28 = smov [#allocation8]   ;;  %s2245_s9 = scalar_lea.hbm %s3017_s3, 512 }
  0x26   :  { %s48_s29 = sshll.u32 %s2347_s28, 4  ;;  %p2246_p2 = scmp.ne.s32.totalorder %s3017_s3, %s2245_s9  ;;  %s49_s29 = int_to_ptr.vmem [resolvable:$true] %s48_s29 }
  0x27   :  { %p2249_p3 = scmp.lt.u32.totalorder %s2245_s9, %s3017_s3 }
  0x29   :  { %p2251_p4 = pnand %p2249_p3, %p2246_p2 }
  0x2b   :  { %2254 = shalt.err (!%p2251_p4)
}
  0x2c   :  { %s2255_s14 = scalar_lea.vmem %s49_s29, 512  ;;  %p2260_p6 = scmp.lt.s32.totalorder %s49_s29, %s49_s29 }
  0x2d   :  { %p2256_p5 = scmp.ne.s32.totalorder %s49_s29, %s2255_s14  ;;  %p2261_p7 = scmp.lt.s32.totalorder %s2255_s14, %s2255_s14 }
  0x2f   :  { %p2262_p8 = por %p2261_p7, %p2260_p6 }
  0x31   :  { %p2263_p9 = pnand %p2262_p8, %p2256_p5 }
  0x33   :  { %2266 = shalt.err (!%p2263_p9)
}
  0x34   :  { %s2348_s0 = smov 128   ;;  %s2349_s15 = smov 8  }
  0x35   :  { %54 = dma.hbm_to_vmem [thread:$0]  %s3017_s3, 512, %s49_s29, [#allocation7], %s2348_s0, %s2348_s0, %s2349_s15  }
  0x36   :  { %2333 = dma.done.wait [#allocation4], 576  }
  0x37   :  { %2334 = vsyncadd [#allocation4], 4294966720 }
  0x38   :  { %2335 = dma.done.wait [#allocation7], 3584  }
  0x39   :  { %2336 = vsyncadd [#allocation7], 4294963712  ;;  %v2350_v0 = vmov 0.0   ;;  %v68_v1 = vld [vmem:[#allocation6 + $0x8] sm:$0xff]  ;;  %v70_v2 = vld [vmem:[#allocation6 + $0x18] sm:$0xff]  ;;  %v173_v39 = vlaneseq  ;;  %s2352_s3 = smov 32  }
  0x3a   :  { %160 = vmatprep.mubr.f32.mxu0 %v2350_v0  ;;  %310 = vmatprep.mubr.f32.mxu1 %v2350_v0  ;;  %v67_v3 = vld [vmem:[#allocation6] sm:$0xff]  ;;  %v2442_v4 = vpack.c.bf16 %v70_v2, %v68_v1  ;;  %v69_v5 = vld [vmem:[#allocation6 + $0x10] sm:$0xff]  ;;  %v72_v6 = vld [vmem:[#allocation6 + $0x28] sm:$0xff]  ;;  %v2351_v37 = vmov 1983009808   ;;  %v2353_v57 = vmov 0  }
  0x3b   :  { %v74_v7 = vld [vmem:[#allocation6 + $0x38] sm:$0xff]  ;;  %v2444_v8 = vpack.c.bf16 %v69_v5, %v67_v3  ;;  %v71_v10 = vld [vmem:[#allocation6 + $0x20] sm:$0xff]  ;;  %v73_v11 = vld [vmem:[#allocation6 + $0x30] sm:$0xff]  ;;  %v171_v38 = vunpack.c.l.s4 %v2351_v37  ;;  %v174_v41 = vshrl.u32 %v173_v39, 7  ;;  %2130 = vset.pattern.permute.xlu1 %v2353_v57  ;;  %2131 = vset.pattern.permute.xlu0 %v2353_v57  ;;  %s2354_s20 = smov 96   ;;  %vm237_vm1 = vcmask 261120  }
  0x3c   :  { %v2446_v9 = vpack.c.bf16 %v74_v7, %v72_v6  ;;  %v76_v12 = vld [vmem:[#allocation6 + $0x48] sm:$0xff]  ;;  %1889 = vmatprep.subr.bf16.mxu0 %v2442_v4  ;;  %v78_v13 = vld [vmem:[#allocation6 + $0x58] sm:$0xff]  ;;  %1913 = vmatprep.subr.bf16.mxu1 %v2442_v4  ;;  %v2451_v14 = vpack.c.bf16 %v73_v11, %v71_v10  ;;  %v75_v16 = vld [vmem:[#allocation6 + $0x40] sm:$0xff]  ;;  %vm239_vm3 = vcmask 523264   ;;  %vm92_vm4 = vcmask 785408  }
  0x3d   :  { %1891 = vmatpush1.bf16.msra.mxu0 %v2444_v8  ;;  %1915 = vmatpush1.bf16.msra.mxu1 %v2444_v8  ;;  %v2455_v15 = vpack.c.bf16 %v78_v13, %v76_v12  ;;  %v77_v17 = vld [vmem:[#allocation6 + $0x50] sm:$0xff]  ;;  %v80_v18 = vld [vmem:[#allocation6 + $0x68] sm:$0xff]  ;;  %v82_v19 = vld [vmem:[#allocation6 + $0x78] sm:$0xff]  ;;  %v172_v40 = vunpack.c.0.s8 %v171_v38  ;;  %vm419_vm6 = vcmask 254976  }
  0x3e   :  { %1893 = vmatprep.subr.bf16.mxu0 %v2446_v9  ;;  %1917 = vmatprep.subr.bf16.mxu1 %v2446_v9  ;;  %v2459_v20 = vpack.c.bf16 %v77_v17, %v75_v16  ;;  %v2463_v21 = vpack.c.bf16 %v82_v19, %v80_v18  ;;  %v79_v22 = vld [vmem:[#allocation6 + $0x60] sm:$0xff]  ;;  %v81_v23 = vld [vmem:[#allocation6 + $0x70] sm:$0xff]  ;;  %v84_v24 = vld [vmem:[#allocation6 + $0x88] sm:$0xff] }
  0x3f   :  { %v86_v25 = vld [vmem:[#allocation6 + $0x98] sm:$0xff]  ;;  %v2467_v26 = vpack.c.bf16 %v81_v23, %v79_v22  ;;  %v83_v28 = vld [vmem:[#allocation6 + $0x80] sm:$0xff]  ;;  %v85_v29 = vld [vmem:[#allocation6 + $0x90] sm:$0xff]  ;;  %v2506_v43 = vsub.s32 %v172_v40, %v174_v41 }
  0x40   :  { %v2471_v27 = vpack.c.bf16 %v86_v25, %v84_v24  ;;  %v88_v30 = vld [vmem:[#allocation6 + $0xa8] sm:$0xff]  ;;  %v90_v31 = vld [vmem:[#allocation6 + $0xb8] sm:$0xff]  ;;  %v2475_v32 = vpack.c.bf16 %v85_v29, %v83_v28  ;;  %v87_v34 = vld [vmem:[#allocation6 + $0xa0] sm:$0xff] }
  0x41   :  { %1895 = vmatpush1.bf16.msra.mxu0 %v2451_v14  ;;  %1919 = vmatpush1.bf16.msra.mxu1 %v2451_v14  ;;  %v2479_v33 = vpack.c.bf16 %v90_v31, %v88_v30  ;;  %v89_v35 = vld [vmem:[#allocation6 + $0xb0] sm:$0xff]  ;;  %v91_v46 = vld [vmem:[#allocation3] sm:$0xf]  ;;  %v2516_v61 = vld [vmem:[%s3015_s1] sm:$0x3] }
  0x42   :  { %1897 = vmatprep.subr.bf16.mxu0 %v2455_v15  ;;  %1921 = vmatprep.subr.bf16.mxu1 %v2455_v15  ;;  %v2483_v36 = vpack.c.bf16 %v89_v35, %v87_v34  ;;  %vm204_vm0 = vcmp.gt.s32.totalorder %v2516_v61, 0  ;;  %v242_v24 = vld [vmem:[#allocation3 + $0x4] sm:$0xf]  ;;  %vm365_vm5 = vcmp.gt.s32.totalorder %v2516_v61, 1  ;;  %vm554_vm8 = vcmp.gt.s32.totalorder %v2516_v61, 2 }
  0x43   :  { %v205_v63 = vsel %vm204_vm0, 1, %v2353_v57  ;;  %vm743_vm10 = vcmp.gt.s32.totalorder %v2516_v61, 3  ;;  %vm932_vm12 = vcmp.gt.s32.totalorder %v2516_v61, 4  ;;  %vm1121_vm14 = vcmp.gt.s32.totalorder %v2516_v61, 5 }
  0x44   :  { %vm1310_vm0 = vcmp.gt.s32.totalorder %v2516_v61, 6 }
  0x45   :  { %1899 = vmatpush1.bf16.msra.mxu0 %v2459_v20  ;;  %1923 = vmatpush1.bf16.msra.mxu1 %v2459_v20 }
  0x46   :  { %1901 = vmatprep.subr.bf16.mxu0 %v2463_v21  ;;  %1925 = vmatprep.subr.bf16.mxu1 %v2463_v21 }
  0x49   :  { %1903 = vmatpush1.bf16.msra.mxu0 %v2467_v26  ;;  %1927 = vmatpush1.bf16.msra.mxu1 %v2467_v26 }
  0x4a   :  { %1905 = vmatprep.subr.bf16.mxu0 %v2471_v27  ;;  %1929 = vmatprep.subr.bf16.mxu1 %v2471_v27 }
  0x4d   :  { %1907 = vmatpush1.bf16.msra.mxu0 %v2475_v32  ;;  %1931 = vmatpush1.bf16.msra.mxu1 %v2475_v32 }
  0x4e   :  { %1909 = vmatprep.subr.bf16.mxu0 %v2479_v33  ;;  %1933 = vmatprep.subr.bf16.mxu1 %v2479_v33 }
  0x51   :  { %1911 = vmatpush1.bf16.msra.mxu0 %v2483_v36  ;;  %1935 = vmatpush1.bf16.msra.mxu1 %v2483_v36 }
  0x52   :  { %1937 = vmatprep.subr.bf16.mxu0 %v2442_v4  ;;  %1961 = vmatprep.subr.bf16.mxu1 %v2442_v4 }
  0x54   :  { %161 = vmatmul.mubr.f32.vlgmr.msra.gmra.mrb[0].mxu0 %v2350_v0 }
  0x55   :  { %1939 = vmatpush1.bf16.msra.mxu0 %v2444_v8  ;;  %499 = vmatprep.mubr.f32.mxu0 %v2350_v0 }
  0x56   :  { %1941 = vmatprep.subr.bf16.mxu0 %v2446_v9 }
  0x59   :  { %1943 = vmatpush1.bf16.msra.mxu0 %v2451_v14 }
  0x5a   :  { %1945 = vmatprep.subr.bf16.mxu0 %v2455_v15 }
  0x5d   :  { %1947 = vmatpush1.bf16.msra.mxu0 %v2459_v20 }
  0x5e   :  { %1949 = vmatprep.subr.bf16.mxu0 %v2463_v21 }
  0x61   :  { %1951 = vmatpush1.bf16.msra.mxu0 %v2467_v26 }
  0x62   :  { %1953 = vmatprep.subr.bf16.mxu0 %v2471_v27 }
  0x65   :  { %1955 = vmatpush1.bf16.msra.mxu0 %v2475_v32 }
  0x66   :  { %1957 = vmatprep.subr.bf16.mxu0 %v2479_v33 }
  0x69   :  { %1959 = vmatpush1.bf16.msra.mxu0 %v2483_v36 }
  0x6a   :  { %1985 = vmatprep.subr.bf16.mxu0 %v2442_v4 }
 0x127   :  { %v162_v42 = vpop.f32.mrb[0].mxu0 }
 0x128   :  { %v164_v44 = vpop.f32.mrb[1].mxu0 }
 0x129   :  { %v169_v45 = vcombine.low %v162_v42, %v164_v44 }
 0x12b   :  { %v176_v47 = vrot.slane %v169_v45, %v2506_v43 }
 0x12d   :  { %v178_v48 = vadd.f32 %v176_v47, %v91_v46 }
 0x12f   :  { %v1835_v49 = vmul.f32 -1.442695, %v178_v48 }
 0x131   :  { %2132 = vpow2.f32 %v1835_v49 }
 0x13b   :  { %v2133_v50 = vpop.eup %2132 }
 0x13c   :  { %v182_v51 = vadd.f32 1.0, %v2133_v50 }
 0x13e   :  { %2134 = vrcp.f32 %v182_v51 }
 0x148   :  { %v2135_v52 = vpop.eup %2134 }
 0x149   :  { %v185_v53 = vmul.f32 2.0, %v2135_v52  ;;  %v187_v58 = vmul.f32 0.0, %v2135_v52 }
 0x14b   :  { %v1836_v54 = vadd.f32 -1.0, %v185_v53 }
 0x14d   :  { %189 = vrot.lane.b32.xlu0 %v1836_v54, %s2345_s2 }
 0x1bf   :  { %v190_v55 = vpop.permute.xlu0 %189 }
 0x1c0   :  { %v192_v56 = vmul.f32 %v2135_v52, %v190_v55 }
 0x1c2   :  { %194 = vrot.lane.b32.xlu0 %v192_v56, %s2352_s3  ;;  %v366_v56 = vsel %vm365_vm5, 1, %v2353_v57 }
 0x234   :  { %v195_v59 = vpop.permute.xlu0 %194 }
 0x235   :  { %v197_v60 = vadd.f32 %v195_v59, %v187_v58 }
 0x237   :  { %2136 = vtanh.f32 %v197_v60  ;;  %v229_v5 = vrot.slane %v197_v60, %v2506_v43 }
 0x241   :  { %v2137_v62 = vpop.eup %2136 }
 0x242   :  { %200 = vrot.lane.b32.xlu1 %v2137_v62, %s2345_s2 }
 0x246   :  { %207 = vperm.xlu1 %2130, %v205_v63  }
 0x2b4   :  { %v201_v1 = vpop.permute.xlu1 %200 }
 0x2b5   :  { %v203_v2 = vmul.f32 %v2135_v52, %v201_v1 }
 0x2b7   :  { %v217_v3 = vrot.slane %v203_v2, %v2506_v43 }
 0x2b9   :  { %218 = vrot.lane.b32.xlu0 %v217_v3, %s2352_s3  ;;  %234 = vrot.lane.b32.xlu1 %v217_v3, %s2345_s2 }
 0x2bd   :  { %230 = vrot.lane.b32.xlu0 %v229_v5, %s2354_s20 }
 0x2c5   :  { %v2526_v6 = vpop.permute.xlu1 %207 }
 0x2c6   :  { %vm209_vm2 = vcmp.eq.s32.totalorder %v2526_v6, 1 }
 0x32b   :  { %v219_v7 = vpop.permute.xlu0 %218  ;;  %v235_v10 = vpop.permute.xlu1 %234 }
 0x32c   :  { %v2531_v11 = vsel %vm209_vm2, %v219_v7, 0.0 }
 0x32d   :  { %v238_v12 = vsel %vm237_vm1, %v2531_v11, %v235_v10 }
 0x32e   :  { %v240_v13 = vsel %vm239_vm3, %v238_v12, 0.0 }
 0x32f   :  { %v231_v16 = vpop.permute.xlu0 %230  ;;  %1837 = vmatmul.mubr.msk.f32.vlgmr.msra.gmra.mrb[0].mxu1 %vm92_vm4, %v240_v13 }
 0x330   :  { %v2539_v17 = vsel %vm209_vm2, %v231_v16, 0.0  ;;  %1963 = vmatpush1.bf16.msra.mxu1 %v2444_v8  ;;  %688 = vmatprep.mubr.f32.mxu1 %v2350_v0 }
 0x331   :  { %v344_v18 = vrot.slane %v2539_v17, %v2506_v43  ;;  %1965 = vmatprep.subr.bf16.mxu1 %v2446_v9 }
 0x333   :  { %345 = vrot.lane.b32.xlu0 %v344_v18, %s2352_s3 }
 0x334   :  { %1967 = vmatpush1.bf16.msra.mxu1 %v2451_v14 }
 0x335   :  { %1969 = vmatprep.subr.bf16.mxu1 %v2455_v15 }
 0x338   :  { %1971 = vmatpush1.bf16.msra.mxu1 %v2459_v20 }
 0x339   :  { %1973 = vmatprep.subr.bf16.mxu1 %v2463_v21 }
 0x33c   :  { %1975 = vmatpush1.bf16.msra.mxu1 %v2467_v26 }
 0x33d   :  { %1977 = vmatprep.subr.bf16.mxu1 %v2471_v27 }
 0x340   :  { %1979 = vmatpush1.bf16.msra.mxu1 %v2475_v32 }
 0x341   :  { %1981 = vmatprep.subr.bf16.mxu1 %v2479_v33 }
 0x344   :  { %1983 = vmatpush1.bf16.msra.mxu1 %v2483_v36 }
 0x345   :  { %2009 = vmatprep.subr.bf16.mxu1 %v2442_v4 }
 0x3a5   :  { %v346_v40 = vpop.permute.xlu0 %345 }
 0x402   :  { %v312_v19 = vpop.f32.mrb[0].mxu1 }
 0x403   :  { %v314_v22 = vpop.f32.mrb[1].mxu1 }
 0x404   :  { %v319_v23 = vcombine.low %v312_v19, %v314_v22 }
 0x406   :  { %v326_v25 = vrot.slane %v319_v23, %v2506_v43 }
 0x408   :  { %v328_v28 = vadd.f32 %v326_v25, %v242_v24 }
 0x40a   :  { %v1838_v29 = vmul.f32 -1.442695, %v328_v28  ;;  %v431_v28 = vld [vmem:[#allocation3 + $0x8] sm:$0xf] }
 0x40c   :  { %2138 = vpow2.f32 %v1838_v29 }
 0x416   :  { %v2139_v30 = vpop.eup %2138 }
 0x417   :  { %v332_v31 = vadd.f32 1.0, %v2139_v30 }
 0x419   :  { %2140 = vrcp.f32 %v332_v31 }
 0x423   :  { %v2141_v34 = vpop.eup %2140 }
 0x424   :  { %396 = vrot.lane.b32.xlu0 %v2141_v34, %s2345_s2  ;;  %v335_v35 = vmul.f32 2.0, %v2141_v34  ;;  %v348_v45 = vmul.f32 %v2141_v34, %v346_v40  ;;  %v407_v50 = vrot.slane %v2141_v34, 2 }
 0x426   :  { %v1839_v37 = vadd.f32 -1.0, %v335_v35 }
 0x428   :  { %350 = vrot.lane.b32.xlu1 %v1839_v37, %s2345_s2 }
 0x496   :  { %v397_v41 = vpop.permute.xlu0 %396 }
 0x497   :  { %v398_v42 = vrot.slane %v397_v41, 2 }
 0x499   :  { %v400_v44 = vmul.f32 2.0, %v398_v42 }
 0x49a   :  { %v351_v38 = vpop.permute.xlu1 %350 }
 0x49b   :  { %v353_v39 = vmul.f32 %v2141_v34, %v351_v38  ;;  %v1840_v48 = vadd.f32 -1.0, %v400_v44 }
 0x49d   :  { %355 = vrot.lane.b32.xlu1 %v353_v39, %s2352_s3  ;;  %v409_v52 = vmul.f32 %v1840_v48, %v407_v50 }
 0x4a1   :  { %402 = vrot.lane.b32.xlu1 %v2141_v34, %s2354_s20 }
 0x4a5   :  { %412 = vrot.lane.b32.xlu1 %v2141_v34, %s2352_s3 }
 0x50f   :  { %v356_v46 = vpop.permute.xlu1 %355 }
 0x510   :  { %v358_v47 = vadd.f32 %v356_v46, %v348_v45 }
 0x512   :  { %2142 = vtanh.f32 %v358_v47  ;;  %v390_v5 = vrot.slane %v358_v47, %v2506_v43 }
 0x513   :  { %v403_v49 = vpop.permute.xlu1 %402 }
 0x514   :  { %v404_v51 = vrot.slane %v403_v49, 2 }
 0x516   :  { %v406_v53 = vmul.f32 0.0, %v404_v51 }
 0x517   :  { %v413_v58 = vpop.permute.xlu1 %412 }
 0x518   :  { %v2563_v54 = vadd.f32 %v409_v52, %v406_v53  ;;  %v414_v59 = vrot.slane %v413_v58, 2 }
 0x51a   :  { %2144 = vtanh.f32 %v2563_v54 }
 0x51c   :  { %v2143_v55 = vpop.eup %2142 }
 0x51d   :  { %361 = vrot.lane.b32.xlu0 %v2143_v55, %s2345_s2  ;;  %v418_v55 = vsel %vm209_vm2, %v2563_v54, 0.0 }
 0x521   :  { %368 = vperm.xlu0 %2131, %v366_v56  }
 0x524   :  { %v2145_v60 = vpop.eup %2144 }
 0x525   :  { %v416_v62 = vmul.f32 %v2145_v60, %v414_v59 }
 0x527   :  { %v2571_v63 = vsel %vm209_vm2, %v416_v62, 0.0 }
 0x528   :  { %425 = vrot.lane.b32.xlu0 %v2571_v63, %s2345_s2  ;;  %420 = vst.msk [vmem:[#allocation2] sm:$0x3] %vm419_vm6, %v2571_v63 }
 0x58f   :  { %v362_v1 = vpop.permute.xlu0 %361 }
 0x590   :  { %v364_v2 = vmul.f32 %v2141_v34, %v362_v1  ;;  %v555_v1 = vsel %vm554_vm8, 1, %v2353_v57 }
 0x592   :  { %v378_v3 = vrot.slane %v364_v2, %v2506_v43 }
 0x594   :  { %379 = vrot.lane.b32.xlu1 %v378_v3, %s2352_s3 }
 0x598   :  { %421 = vrot.lane.b32.xlu1 %v378_v3, %s2345_s2 }
 0x59c   :  { %391 = vrot.lane.b32.xlu1 %v390_v5, %s2354_s20 }
 0x5a0   :  { %v2582_v7 = vpop.permute.xlu0 %368 }
 0x5a1   :  { %vm370_vm7 = vcmp.eq.s32.totalorder %v2582_v7, 1 }
 0x5a4   :  { %v426_v16 = vpop.permute.xlu0 %425 }
 0x606   :  { %v380_v10 = vpop.permute.xlu1 %379 }
 0x607   :  { %v2588_v12 = vsel %vm370_vm7, %v380_v10, %v2531_v11 }
 0x60a   :  { %v422_v13 = vpop.permute.xlu1 %421 }
 0x60b   :  { %v428_v18 = vsel %vm237_vm1, %v2588_v12, %v422_v13 }
 0x60c   :  { %v429_v19 = vsel %vm239_vm3, %v428_v18, %v426_v16 }
 0x60d   :  { %1841 = vmatmul.mubr.msk.f32.vlgmr.msra.gmra.mrb[2].mxu0 %vm92_vm4, %v429_v19 }
 0x60e   :  { %v392_v22 = vpop.permute.xlu1 %391  ;;  %1987 = vmatpush1.bf16.msra.mxu0 %v2444_v8  ;;  %877 = vmatprep.mubr.f32.mxu0 %v2350_v0 }
 0x60f   :  { %v2599_v23 = vsel %vm370_vm7, %v392_v22, %v2539_v17  ;;  %1989 = vmatprep.subr.bf16.mxu0 %v2446_v9 }
 0x610   :  { %v533_v11 = vrot.slane %v2599_v23, %v2506_v43 }
 0x612   :  { %534 = vrot.lane.b32.xlu1 %v533_v11, %s2352_s3  ;;  %1991 = vmatpush1.bf16.msra.mxu0 %v2451_v14 }
 0x613   :  { %1993 = vmatprep.subr.bf16.mxu0 %v2455_v15 }
 0x616   :  { %1995 = vmatpush1.bf16.msra.mxu0 %v2459_v20 }
 0x617   :  { %1997 = vmatprep.subr.bf16.mxu0 %v2463_v21 }
 0x61a   :  { %1999 = vmatpush1.bf16.msra.mxu0 %v2467_v26 }
 0x61b   :  { %2001 = vmatprep.subr.bf16.mxu0 %v2471_v27 }
 0x61e   :  { %2003 = vmatpush1.bf16.msra.mxu0 %v2475_v32 }
 0x61f   :  { %2005 = vmatprep.subr.bf16.mxu0 %v2479_v33 }
 0x622   :  { %2007 = vmatpush1.bf16.msra.mxu0 %v2483_v36 }
 0x623   :  { %2033 = vmatprep.subr.bf16.mxu0 %v2442_v4 }
 0x684   :  { %v535_v42 = vpop.permute.xlu1 %534 }
 0x6e0   :  { %v501_v17 = vpop.f32.mrb[2].mxu0 }
 0x6e1   :  { %v503_v24 = vpop.f32.mrb[3].mxu0 }
 0x6e2   :  { %v508_v25 = vcombine.low %v501_v17, %v503_v24 }
 0x6e4   :  { %v515_v29 = vrot.slane %v508_v25, %v2506_v43 }
 0x6e6   :  { %v517_v30 = vadd.f32 %v515_v29, %v431_v28 }
 0x6e8   :  { %v1842_v31 = vmul.f32 -1.442695, %v517_v30 }
 0x6ea   :  { %2146 = vpow2.f32 %v1842_v31 }
 0x6f4   :  { %v2147_v34 = vpop.eup %2146 }
 0x6f5   :  { %v521_v35 = vadd.f32 1.0, %v2147_v34  ;;  %v620_v34 = vld [vmem:[#allocation3 + $0xc] sm:$0xf] }
 0x6f7   :  { %2148 = vrcp.f32 %v521_v35 }
 0x701   :  { %v2149_v37 = vpop.eup %2148 }
 0x702   :  { %585 = vrot.lane.b32.xlu1 %v2149_v37, %s2345_s2  ;;  %v524_v38 = vmul.f32 2.0, %v2149_v37  ;;  %v537_v47 = vmul.f32 %v2149_v37, %v535_v42  ;;  %v596_v52 = vrot.slane %v2149_v37, 2 }
 0x704   :  { %v1843_v39 = vadd.f32 -1.0, %v524_v38 }
 0x706   :  { %539 = vrot.lane.b32.xlu0 %v1843_v39, %s2345_s2 }
 0x774   :  { %v586_v44 = vpop.permute.xlu1 %585 }
 0x775   :  { %v587_v45 = vrot.slane %v586_v44, 2 }
 0x777   :  { %v589_v46 = vmul.f32 2.0, %v587_v45 }
 0x778   :  { %v540_v40 = vpop.permute.xlu0 %539 }
 0x779   :  { %v542_v41 = vmul.f32 %v2149_v37, %v540_v40  ;;  %v1844_v50 = vadd.f32 -1.0, %v589_v46 }
 0x77b   :  { %544 = vrot.lane.b32.xlu0 %v542_v41, %s2352_s3  ;;  %v598_v56 = vmul.f32 %v1844_v50, %v596_v52 }
 0x77f   :  { %591 = vrot.lane.b32.xlu0 %v2149_v37, %s2354_s20 }
 0x783   :  { %601 = vrot.lane.b32.xlu0 %v2149_v37, %s2352_s3 }
 0x7ed   :  { %v545_v48 = vpop.permute.xlu0 %544 }
 0x7ee   :  { %v547_v49 = vadd.f32 %v545_v48, %v537_v47 }
 0x7f0   :  { %2150 = vtanh.f32 %v547_v49  ;;  %v579_v18 = vrot.slane %v547_v49, %v2506_v43 }
 0x7f1   :  { %v592_v51 = vpop.permute.xlu0 %591 }
 0x7f2   :  { %v593_v53 = vrot.slane %v592_v51, 2 }
 0x7f4   :  { %v595_v58 = vmul.f32 %v593_v53, %v418_v55 }
 0x7f5   :  { %v602_v2 = vpop.permute.xlu0 %601 }
 0x7f6   :  { %v599_v59 = vadd.f32 %v598_v56, %v595_v58  ;;  %v603_v3 = vrot.slane %v602_v2, 2 }
 0x7f8   :  { %2152 = vtanh.f32 %v599_v59  ;;  %v2626_v60 = vsel %vm370_vm7, %v599_v59, %v418_v55 }
 0x7fa   :  { %v2151_v62 = vpop.eup %2150 }
 0x7fb   :  { %550 = vrot.lane.b32.xlu1 %v2151_v62, %s2345_s2 }
 0x7ff   :  { %557 = vperm.xlu1 %2130, %v555_v1  }
 0x802   :  { %v2153_v6 = vpop.eup %2152 }
 0x803   :  { %v605_v54 = vmul.f32 %v2153_v6, %v603_v3 }
 0x805   :  { %v608_v5 = vsel %vm370_vm7, %v605_v54, 0.0  ;;  %v2641_v19 = vsel %vm370_vm7, %v605_v54, %v2571_v63  ;;  %v744_v54 = vsel %vm743_vm10, 1, %v2353_v57 }
 0x806   :  { %609 = vst.msk [vmem:[#allocation2 + $0x2] sm:$0x3] %vm419_vm6, %v608_v5 }
 0x86d   :  { %v551_v10 = vpop.permute.xlu1 %550 }
 0x86e   :  { %v553_v13 = vmul.f32 %v2149_v37, %v551_v10 }
 0x870   :  { %v567_v16 = vrot.slane %v553_v13, %v2506_v43 }
 0x872   :  { %610 = vrot.lane.b32.xlu1 %v567_v16, %s2345_s2  ;;  %568 = vrot.lane.b32.xlu0 %v567_v16, %s2352_s3 }
 0x876   :  { %580 = vrot.lane.b32.xlu1 %v579_v18, %s2354_s20  ;;  %614 = vrot.lane.b32.xlu0 %v2641_v19, %s2345_s2 }
 0x87e   :  { %v2646_v22 = vpop.permute.xlu1 %557 }
 0x87f   :  { %vm559_vm9 = vcmp.eq.s32.totalorder %v2646_v22, 1 }
 0x8e4   :  { %v569_v11 = vpop.permute.xlu0 %568  ;;  %v611_v17 = vpop.permute.xlu1 %610 }
 0x8e5   :  { %v2652_v24 = vsel %vm559_vm9, %v569_v11, %v2588_v12 }
 0x8e6   :  { %v617_v63 = vsel %vm237_vm1, %v2652_v24, %v611_v17 }
 0x8e8   :  { %v615_v7 = vpop.permute.xlu0 %614  ;;  %v581_v25 = vpop.permute.xlu1 %580 }
 0x8e9   :  { %v618_v28 = vsel %vm239_vm3, %v617_v63, %v615_v7  ;;  %v2660_v29 = vsel %vm559_vm9, %v581_v25, %v2599_v23 }
 0x8ea   :  { %v722_v30 = vrot.slane %v2660_v29, %v2506_v43  ;;  %1845 = vmatmul.mubr.msk.f32.vlgmr.msra.gmra.mrb[2].mxu1 %vm92_vm4, %v618_v28 }
 0x8eb   :  { %2011 = vmatpush1.bf16.msra.mxu1 %v2444_v8  ;;  %1066 = vmatprep.mubr.f32.mxu1 %v2350_v0 }
 0x8ec   :  { %723 = vrot.lane.b32.xlu1 %v722_v30, %s2352_s3  ;;  %2013 = vmatprep.subr.bf16.mxu1 %v2446_v9 }
 0x8ef   :  { %2015 = vmatpush1.bf16.msra.mxu1 %v2451_v14 }
 0x8f0   :  { %2017 = vmatprep.subr.bf16.mxu1 %v2455_v15 }
 0x8f3   :  { %2019 = vmatpush1.bf16.msra.mxu1 %v2459_v20 }
 0x8f4   :  { %2021 = vmatprep.subr.bf16.mxu1 %v2463_v21 }
 0x8f7   :  { %2023 = vmatpush1.bf16.msra.mxu1 %v2467_v26 }
 0x8f8   :  { %2025 = vmatprep.subr.bf16.mxu1 %v2471_v27 }
 0x8fb   :  { %2027 = vmatpush1.bf16.msra.mxu1 %v2475_v32 }
 0x8fc   :  { %2029 = vmatprep.subr.bf16.mxu1 %v2479_v33 }
 0x8ff   :  { %2031 = vmatpush1.bf16.msra.mxu1 %v2483_v36 }
 0x900   :  { %2057 = vmatprep.subr.bf16.mxu1 %v2442_v4 }
 0x95e   :  { %v724_v47 = vpop.permute.xlu1 %723 }
 0x9bd   :  { %v690_v12 = vpop.f32.mrb[2].mxu1 }
 0x9be   :  { %v692_v23 = vpop.f32.mrb[3].mxu1 }
 0x9bf   :  { %v697_v31 = vcombine.low %v690_v12, %v692_v23 }
 0x9c1   :  { %v704_v35 = vrot.slane %v697_v31, %v2506_v43 }
 0x9c3   :  { %v706_v37 = vadd.f32 %v704_v35, %v620_v34 }
 0x9c5   :  { %v1846_v38 = vmul.f32 -1.442695, %v706_v37 }
 0x9c7   :  { %2154 = vpow2.f32 %v1846_v38  ;;  %v809_v38 = vld [vmem:[#allocation3 + $0x10] sm:$0xf] }
 0x9d1   :  { %v2155_v39 = vpop.eup %2154 }
 0x9d2   :  { %v710_v40 = vadd.f32 1.0, %v2155_v39 }
 0x9d4   :  { %2156 = vrcp.f32 %v710_v40 }
 0x9de   :  { %v2157_v41 = vpop.eup %2156 }
 0x9df   :  { %774 = vrot.lane.b32.xlu1 %v2157_v41, %s2345_s2  ;;  %v713_v42 = vmul.f32 2.0, %v2157_v41  ;;  %v726_v51 = vmul.f32 %v2157_v41, %v724_v47  ;;  %v785_v58 = vrot.slane %v2157_v41, 2 }
 0x9e1   :  { %v1847_v44 = vadd.f32 -1.0, %v713_v42 }
 0x9e3   :  { %728 = vrot.lane.b32.xlu0 %v1847_v44, %s2345_s2 }
 0xa51   :  { %v775_v48 = vpop.permute.xlu1 %774 }
 0xa52   :  { %v776_v49 = vrot.slane %v775_v48, 2 }
 0xa54   :  { %v778_v50 = vmul.f32 2.0, %v776_v49 }
 0xa55   :  { %v729_v45 = vpop.permute.xlu0 %728 }
 0xa56   :  { %v731_v46 = vmul.f32 %v2157_v41, %v729_v45  ;;  %v1848_v55 = vadd.f32 -1.0, %v778_v50 }
 0xa58   :  { %733 = vrot.lane.b32.xlu0 %v731_v46, %s2352_s3  ;;  %v787_v62 = vmul.f32 %v1848_v55, %v785_v58 }
 0xa5c   :  { %780 = vrot.lane.b32.xlu0 %v2157_v41, %s2354_s20 }
 0xa60   :  { %790 = vrot.lane.b32.xlu0 %v2157_v41, %s2352_s3 }
 0xaca   :  { %v734_v52 = vpop.permute.xlu0 %733 }
 0xacb   :  { %v736_v53 = vadd.f32 %v734_v52, %v726_v51 }
 0xacd   :  { %2158 = vtanh.f32 %v736_v53  ;;  %v768_v63 = vrot.slane %v736_v53, %v2506_v43 }
 0xace   :  { %v781_v56 = vpop.permute.xlu0 %780 }
 0xacf   :  { %v782_v59 = vrot.slane %v781_v56, 2 }
 0xad1   :  { %v784_v1 = vmul.f32 %v782_v59, %v2626_v60 }
 0xad2   :  { %v791_v5 = vpop.permute.xlu0 %790 }
 0xad3   :  { %v788_v2 = vadd.f32 %v787_v62, %v784_v1  ;;  %v792_v10 = vrot.slane %v791_v5, 2 }
 0xad5   :  { %2160 = vtanh.f32 %v788_v2  ;;  %v2689_v3 = vsel %vm559_vm9, %v788_v2, %v2626_v60 }
 0xad7   :  { %v2159_v6 = vpop.eup %2158 }
 0xad8   :  { %739 = vrot.lane.b32.xlu1 %v2159_v6, %s2345_s2 }
 0xadc   :  { %746 = vperm.xlu1 %2130, %v744_v54  }
 0xadf   :  { %v2161_v13 = vpop.eup %2160 }
 0xae0   :  { %v794_v16 = vmul.f32 %v2161_v13, %v792_v10  ;;  %v933_v13 = vsel %vm932_vm12, 1, %v2353_v57 }
 0xae2   :  { %v797_v18 = vsel %vm559_vm9, %v794_v16, 0.0  ;;  %v2704_v7 = vsel %vm559_vm9, %v794_v16, %v2641_v19 }
 0xae3   :  { %798 = vst.msk [vmem:[#allocation2 + $0x4] sm:$0x3] %vm419_vm6, %v797_v18 }
 0xb4a   :  { %v740_v11 = vpop.permute.xlu1 %739 }
 0xb4b   :  { %v742_v60 = vmul.f32 %v2157_v41, %v740_v11 }
 0xb4d   :  { %v756_v17 = vrot.slane %v742_v60, %v2506_v43 }
 0xb4f   :  { %799 = vrot.lane.b32.xlu1 %v756_v17, %s2345_s2  ;;  %757 = vrot.lane.b32.xlu0 %v756_v17, %s2352_s3 }
 0xb53   :  { %769 = vrot.lane.b32.xlu1 %v768_v63, %s2354_s20  ;;  %803 = vrot.lane.b32.xlu0 %v2704_v7, %s2345_s2 }
 0xb5b   :  { %v2709_v25 = vpop.permute.xlu1 %746 }
 0xb5c   :  { %vm748_vm11 = vcmp.eq.s32.totalorder %v2709_v25, 1 }
 0xbc1   :  { %v758_v28 = vpop.permute.xlu0 %757  ;;  %v800_v30 = vpop.permute.xlu1 %799 }
 0xbc2   :  { %v2715_v12 = vsel %vm748_vm11, %v758_v28, %v2652_v24 }
 0xbc3   :  { %v806_v19 = vsel %vm237_vm1, %v2715_v12, %v800_v30 }
 0xbc5   :  { %v804_v22 = vpop.permute.xlu0 %803  ;;  %v770_v23 = vpop.permute.xlu1 %769 }
 0xbc6   :  { %v807_v31 = vsel %vm239_vm3, %v806_v19, %v804_v22  ;;  %v2723_v34 = vsel %vm748_vm11, %v770_v23, %v2660_v29 }
 0xbc7   :  { %v911_v35 = vrot.slane %v2723_v34, %v2506_v43  ;;  %1849 = vmatmul.mubr.msk.f32.vlgmr.msra.gmra.mrb[4].mxu0 %vm92_vm4, %v807_v31 }
 0xbc8   :  { %2035 = vmatpush1.bf16.msra.mxu0 %v2444_v8  ;;  %1255 = vmatprep.mubr.f32.mxu0 %v2350_v0 }
 0xbc9   :  { %912 = vrot.lane.b32.xlu1 %v911_v35, %s2352_s3  ;;  %2037 = vmatprep.subr.bf16.mxu0 %v2446_v9 }
 0xbcc   :  { %2039 = vmatpush1.bf16.msra.mxu0 %v2451_v14 }
 0xbcd   :  { %2041 = vmatprep.subr.bf16.mxu0 %v2455_v15 }
 0xbd0   :  { %2043 = vmatpush1.bf16.msra.mxu0 %v2459_v20 }
 0xbd1   :  { %2045 = vmatprep.subr.bf16.mxu0 %v2463_v21 }
 0xbd4   :  { %2047 = vmatpush1.bf16.msra.mxu0 %v2467_v26 }
 0xbd5   :  { %2049 = vmatprep.subr.bf16.mxu0 %v2471_v27 }
 0xbd8   :  { %2051 = vmatpush1.bf16.msra.mxu0 %v2475_v32 }
 0xbd9   :  { %2053 = vmatprep.subr.bf16.mxu0 %v2479_v33 }
 0xbdc   :  { %2055 = vmatpush1.bf16.msra.mxu0 %v2483_v36 }
 0xbdd   :  { %2081 = vmatprep.subr.bf16.mxu0 %v2442_v4 }
 0xc3b   :  { %v913_v49 = vpop.permute.xlu1 %912 }
 0xc9a   :  { %v879_v24 = vpop.f32.mrb[4].mxu0 }
 0xc9b   :  { %v881_v29 = vpop.f32.mrb[5].mxu0 }
 0xc9c   :  { %v886_v37 = vcombine.low %v879_v24, %v881_v29 }
 0xc9e   :  { %v893_v39 = vrot.slane %v886_v37, %v2506_v43 }
 0xca0   :  { %v895_v40 = vadd.f32 %v893_v39, %v809_v38 }
 0xca2   :  { %v1850_v41 = vmul.f32 -1.442695, %v895_v40  ;;  %v998_v40 = vld [vmem:[#allocation3 + $0x14] sm:$0xf] }
 0xca4   :  { %2162 = vpow2.f32 %v1850_v41 }
 0xcae   :  { %v2163_v42 = vpop.eup %2162 }
 0xcaf   :  { %v899_v44 = vadd.f32 1.0, %v2163_v42 }
 0xcb1   :  { %2164 = vrcp.f32 %v899_v44 }
 0xcbb   :  { %v2165_v45 = vpop.eup %2164 }
 0xcbc   :  { %963 = vrot.lane.b32.xlu1 %v2165_v45, %s2345_s2  ;;  %v902_v46 = vmul.f32 2.0, %v2165_v45  ;;  %v915_v53 = vmul.f32 %v2165_v45, %v913_v49  ;;  %v974_v62 = vrot.slane %v2165_v45, 2 }
 0xcbe   :  { %v1851_v47 = vadd.f32 -1.0, %v902_v46 }
 0xcc0   :  { %917 = vrot.lane.b32.xlu0 %v1851_v47, %s2345_s2 }
 0xd2e   :  { %v964_v50 = vpop.permute.xlu1 %963 }
 0xd2f   :  { %v965_v51 = vrot.slane %v964_v50, 2 }
 0xd31   :  { %v967_v52 = vmul.f32 2.0, %v965_v51 }
 0xd32   :  { %v918_v4 = vpop.permute.xlu0 %917 }
 0xd33   :  { %v920_v48 = vmul.f32 %v2165_v45, %v918_v4  ;;  %v1852_v58 = vadd.f32 -1.0, %v967_v52 }
 0xd35   :  { %922 = vrot.lane.b32.xlu0 %v920_v48, %s2352_s3  ;;  %v976_v2 = vmul.f32 %v1852_v58, %v974_v62 }
 0xd39   :  { %969 = vrot.lane.b32.xlu0 %v2165_v45, %s2354_s20 }
 0xd3d   :  { %979 = vrot.lane.b32.xlu0 %v2165_v45, %s2352_s3 }
 0xda7   :  { %v923_v55 = vpop.permute.xlu0 %922 }
 0xda8   :  { %v925_v56 = vadd.f32 %v923_v55, %v915_v53 }
 0xdaa   :  { %2166 = vtanh.f32 %v925_v56  ;;  %v957_v30 = vrot.slane %v925_v56, %v2506_v43 }
 0xdab   :  { %v970_v59 = vpop.permute.xlu0 %969 }
 0xdac   :  { %v971_v1 = vrot.slane %v970_v59, 2 }
 0xdae   :  { %v973_v6 = vmul.f32 %v971_v1, %v2689_v3 }
 0xdaf   :  { %v980_v16 = vpop.permute.xlu0 %979 }
 0xdb0   :  { %v977_v54 = vadd.f32 %v976_v2, %v973_v6  ;;  %v981_v18 = vrot.slane %v980_v16, 2 }
 0xdb2   :  { %2168 = vtanh.f32 %v977_v54  ;;  %v2752_v5 = vsel %vm748_vm11, %v977_v54, %v2689_v3 }
 0xdb4   :  { %v2167_v10 = vpop.eup %2166 }
 0xdb5   :  { %928 = vrot.lane.b32.xlu1 %v2167_v10, %s2345_s2 }
 0xdb9   :  { %935 = vperm.xlu1 %2130, %v933_v13  }
 0xdbc   :  { %v2169_v11 = vpop.eup %2168 }
 0xdbd   :  { %v983_v60 = vmul.f32 %v2169_v11, %v981_v18  ;;  %v1122_v11 = vsel %vm1121_vm14, 1, %v2353_v57 }
 0xdbf   :  { %v986_v17 = vsel %vm748_vm11, %v983_v60, 0.0  ;;  %v2767_v19 = vsel %vm748_vm11, %v983_v60, %v2704_v7 }
 0xdc0   :  { %987 = vst.msk [vmem:[#allocation2 + $0x6] sm:$0x3] %vm419_vm6, %v986_v17 }
 0xe27   :  { %v929_v63 = vpop.permute.xlu1 %928 }
 0xe28   :  { %v931_v3 = vmul.f32 %v2165_v45, %v929_v63 }
 0xe2a   :  { %v945_v28 = vrot.slane %v931_v3, %v2506_v43 }
 0xe2c   :  { %988 = vrot.lane.b32.xlu1 %v945_v28, %s2345_s2  ;;  %946 = vrot.lane.b32.xlu0 %v945_v28, %s2352_s3 }
 0xe30   :  { %958 = vrot.lane.b32.xlu1 %v957_v30, %s2354_s20  ;;  %992 = vrot.lane.b32.xlu0 %v2767_v19, %s2345_s2 }
 0xe38   :  { %v2772_v22 = vpop.permute.xlu1 %935 }
 0xe39   :  { %vm937_vm13 = vcmp.eq.s32.totalorder %v2772_v22, 1 }
 0xe9e   :  { %v947_v23 = vpop.permute.xlu0 %946  ;;  %v989_v31 = vpop.permute.xlu1 %988 }
 0xe9f   :  { %v2778_v35 = vsel %vm937_vm13, %v947_v23, %v2715_v12 }
 0xea0   :  { %v995_v7 = vsel %vm237_vm1, %v2778_v35, %v989_v31 }
 0xea2   :  { %v993_v25 = vpop.permute.xlu0 %992  ;;  %v959_v24 = vpop.permute.xlu1 %958 }
 0xea3   :  { %v996_v29 = vsel %vm239_vm3, %v995_v7, %v993_v25  ;;  %v2786_v37 = vsel %vm937_vm13, %v959_v24, %v2723_v34 }
 0xea4   :  { %v1100_v38 = vrot.slane %v2786_v37, %v2506_v43  ;;  %1853 = vmatmul.mubr.msk.f32.vlgmr.msra.gmra.mrb[4].mxu1 %vm92_vm4, %v996_v29 }
 0xea5   :  { %2059 = vmatpush1.bf16.msra.mxu1 %v2444_v8  ;;  %1444 = vmatprep.mubr.f32.mxu1 %v2350_v0 }
 0xea6   :  { %1101 = vrot.lane.b32.xlu1 %v1100_v38, %s2352_s3  ;;  %2061 = vmatprep.subr.bf16.mxu1 %v2446_v9 }
 0xea9   :  { %2063 = vmatpush1.bf16.msra.mxu1 %v2451_v14 }
 0xeaa   :  { %2065 = vmatprep.subr.bf16.mxu1 %v2455_v15 }
 0xead   :  { %2067 = vmatpush1.bf16.msra.mxu1 %v2459_v20 }
 0xeae   :  { %2069 = vmatprep.subr.bf16.mxu1 %v2463_v21 }
 0xeb1   :  { %2071 = vmatpush1.bf16.msra.mxu1 %v2467_v26 }
 0xeb2   :  { %2073 = vmatprep.subr.bf16.mxu1 %v2471_v27 }
 0xeb5   :  { %2075 = vmatpush1.bf16.msra.mxu1 %v2475_v32 }
 0xeb6   :  { %2077 = vmatprep.subr.bf16.mxu1 %v2479_v33 }
 0xeb9   :  { %2079 = vmatpush1.bf16.msra.mxu1 %v2483_v36 }
 0xf18   :  { %v1102_v51 = vpop.permute.xlu1 %1101 }
 0xf77   :  { %v1068_v12 = vpop.f32.mrb[4].mxu1 }
 0xf78   :  { %v1070_v34 = vpop.f32.mrb[5].mxu1 }
 0xf79   :  { %v1075_v39 = vcombine.low %v1068_v12, %v1070_v34 }
 0xf7b   :  { %v1082_v41 = vrot.slane %v1075_v39, %v2506_v43 }
 0xf7d   :  { %v1084_v42 = vadd.f32 %v1082_v41, %v998_v40 }
 0xf7f   :  { %v1854_v44 = vmul.f32 -1.442695, %v1084_v42 }
 0xf81   :  { %2170 = vpow2.f32 %v1854_v44 }
 0xf8b   :  { %v2171_v45 = vpop.eup %2170 }
 0xf8c   :  { %v1088_v46 = vadd.f32 1.0, %v2171_v45 }
 0xf8e   :  { %2172 = vrcp.f32 %v1088_v46 }
 0xf98   :  { %v2173_v47 = vpop.eup %2172 }
 0xf99   :  { %1152 = vrot.lane.b32.xlu1 %v2173_v47, %s2345_s2  ;;  %v1091_v4 = vmul.f32 2.0, %v2173_v47  ;;  %v1104_v56 = vmul.f32 %v2173_v47, %v1102_v51  ;;  %v1163_v2 = vrot.slane %v2173_v47, 2 }
 0xf9b   :  { %v1855_v48 = vadd.f32 -1.0, %v1091_v4 }
 0xf9d   :  { %1106 = vrot.lane.b32.xlu0 %v1855_v48, %s2345_s2 }
0x100b   :  { %v1153_v52 = vpop.permute.xlu1 %1152 }
0x100c   :  { %v1154_v53 = vrot.slane %v1153_v52, 2 }
0x100e   :  { %v1156_v55 = vmul.f32 2.0, %v1154_v53 }
0x100f   :  { %v1107_v49 = vpop.permute.xlu0 %1106 }
0x1010   :  { %v1109_v50 = vmul.f32 %v2173_v47, %v1107_v49  ;;  %v1856_v62 = vadd.f32 -1.0, %v1156_v55 }
0x1012   :  { %1111 = vrot.lane.b32.xlu0 %v1109_v50, %s2352_s3  ;;  %v1165_v54 = vmul.f32 %v1856_v62, %v1163_v2 }
0x1016   :  { %1158 = vrot.lane.b32.xlu0 %v2173_v47, %s2354_s20 }
0x101a   :  { %1168 = vrot.lane.b32.xlu0 %v2173_v47, %s2352_s3 }
0x1084   :  { %v1112_v58 = vpop.permute.xlu0 %1111 }
0x1085   :  { %v1114_v59 = vadd.f32 %v1112_v58, %v1104_v56 }
0x1087   :  { %2174 = vtanh.f32 %v1114_v59  ;;  %v1146_v31 = vrot.slane %v1114_v59, %v2506_v43  ;;  %v1311_v59 = vsel %vm1310_vm0, 1, %v2353_v57 }
0x1088   :  { %v1159_v1 = vpop.permute.xlu0 %1158 }
0x1089   :  { %v1160_v6 = vrot.slane %v1159_v1, 2 }
0x108b   :  { %v1162_v10 = vmul.f32 %v1160_v6, %v2752_v5 }
0x108c   :  { %v1169_v60 = vpop.permute.xlu0 %1168 }
0x108d   :  { %v1166_v13 = vadd.f32 %v1165_v54, %v1162_v10  ;;  %v1170_v17 = vrot.slane %v1169_v60, 2 }
0x108f   :  { %2176 = vtanh.f32 %v1166_v13  ;;  %v2814_v16 = vsel %vm937_vm13, %v1166_v13, %v2752_v5 }
0x1091   :  { %v2175_v18 = vpop.eup %2174 }
0x1092   :  { %1117 = vrot.lane.b32.xlu1 %v2175_v18, %s2345_s2 }
0x1096   :  { %1124 = vperm.xlu1 %2130, %v1122_v11  }
0x1099   :  { %v2177_v63 = vpop.eup %2176 }
0x109a   :  { %v1172_v3 = vmul.f32 %v2177_v63, %v1170_v17 }
0x109c   :  { %v1175_v28 = vsel %vm937_vm13, %v1172_v3, 0.0  ;;  %v2829_v7 = vsel %vm937_vm13, %v1172_v3, %v2767_v19 }
0x109d   :  { %1176 = vst.msk [vmem:[#allocation2 + $0x8] sm:$0x3] %vm419_vm6, %v1175_v28 }
0x1104   :  { %v1118_v30 = vpop.permute.xlu1 %1117 }
0x1105   :  { %v1120_v5 = vmul.f32 %v2173_v47, %v1118_v30 }
0x1107   :  { %v1134_v23 = vrot.slane %v1120_v5, %v2506_v43 }
0x1109   :  { %1177 = vrot.lane.b32.xlu1 %v1134_v23, %s2345_s2  ;;  %1135 = vrot.lane.b32.xlu0 %v1134_v23, %s2352_s3 }
0x110d   :  { %1147 = vrot.lane.b32.xlu1 %v1146_v31, %s2354_s20  ;;  %1181 = vrot.lane.b32.xlu0 %v2829_v7, %s2345_s2 }
0x1115   :  { %v2834_v25 = vpop.permute.xlu1 %1124 }
0x1116   :  { %vm1126_vm15 = vcmp.eq.s32.totalorder %v2834_v25, 1 }
0x117b   :  { %v1136_v24 = vpop.permute.xlu0 %1135  ;;  %v1178_v29 = vpop.permute.xlu1 %1177 }
0x117c   :  { %v2840_v38 = vsel %vm1126_vm15, %v1136_v24, %v2778_v35 }
0x117d   :  { %v1184_v19 = vsel %vm237_vm1, %v2840_v38, %v1178_v29 }
0x117f   :  { %v1182_v22 = vpop.permute.xlu0 %1181  ;;  %v1148_v12 = vpop.permute.xlu1 %1147 }
0x1180   :  { %v1185_v34 = vsel %vm239_vm3, %v1184_v19, %v1182_v22  ;;  %v2848_v39 = vsel %vm1126_vm15, %v1148_v12, %v2786_v37 }
0x1181   :  { %v1289_v40 = vrot.slane %v2848_v39, %v2506_v43  ;;  %1857 = vmatmul.mubr.msk.f32.vlgmr.msra.gmra.mrb[6].mxu0 %vm92_vm4, %v1185_v34 }
0x1182   :  { %2083 = vmatpush1.bf16.msra.mxu0 %v2444_v8  ;;  %1633 = vmatprep.mubr.f32.mxu0 %v2350_v0 }
0x1183   :  { %1290 = vrot.lane.b32.xlu1 %v1289_v40, %s2352_s3  ;;  %2085 = vmatprep.subr.bf16.mxu0 %v2446_v9 }
0x1186   :  { %2087 = vmatpush1.bf16.msra.mxu0 %v2451_v14  ;;  %v1187_v14 = vld [vmem:[#allocation3 + $0x18] sm:$0xf] }
0x1187   :  { %2089 = vmatprep.subr.bf16.mxu0 %v2455_v15 }
0x118a   :  { %2091 = vmatpush1.bf16.msra.mxu0 %v2459_v20 }
0x118b   :  { %2093 = vmatprep.subr.bf16.mxu0 %v2463_v21 }
0x118e   :  { %2095 = vmatpush1.bf16.msra.mxu0 %v2467_v26 }
0x118f   :  { %2097 = vmatprep.subr.bf16.mxu0 %v2471_v27 }
0x1192   :  { %2099 = vmatpush1.bf16.msra.mxu0 %v2475_v32 }
0x1193   :  { %2101 = vmatprep.subr.bf16.mxu0 %v2479_v33 }
0x1196   :  { %2103 = vmatpush1.bf16.msra.mxu0 %v2483_v36 }
0x11f5   :  { %v1291_v41 = vpop.permute.xlu1 %1290 }
0x1254   :  { %v1257_v0 = vpop.f32.mrb[6].mxu0 }
0x1255   :  { %v1259_v8 = vpop.f32.mrb[7].mxu0 }
0x1256   :  { %v1264_v9 = vcombine.low %v1257_v0, %v1259_v8 }
0x1258   :  { %v1271_v15 = vrot.slane %v1264_v9, %v2506_v43 }
0x125a   :  { %v1273_v35 = vadd.f32 %v1271_v15, %v1187_v14 }
0x125c   :  { %v1858_v20 = vmul.f32 -1.442695, %v1273_v35 }
0x125e   :  { %2178 = vpow2.f32 %v1858_v20 }
0x1268   :  { %v2179_v21 = vpop.eup %2178 }
0x1269   :  { %v1277_v37 = vadd.f32 1.0, %v2179_v21 }
0x126b   :  { %2180 = vrcp.f32 %v1277_v37 }
0x1275   :  { %v2181_v26 = vpop.eup %2180 }
0x1276   :  { %1341 = vrot.lane.b32.xlu1 %v2181_v26, %s2345_s2  ;;  %v1280_v27 = vmul.f32 2.0, %v2181_v26  ;;  %v1293_v46 = vmul.f32 %v2181_v26, %v1291_v41  ;;  %v1352_v50 = vrot.slane %v2181_v26, 2 }
0x1278   :  { %v1859_v32 = vadd.f32 -1.0, %v1280_v27 }
0x127a   :  { %1295 = vrot.lane.b32.xlu0 %v1859_v32, %s2345_s2 }
0x12e8   :  { %v1342_v42 = vpop.permute.xlu1 %1341 }
0x12e9   :  { %v1343_v44 = vrot.slane %v1342_v42, 2 }
0x12eb   :  { %v1345_v45 = vmul.f32 2.0, %v1343_v44 }
0x12ec   :  { %v1296_v33 = vpop.permute.xlu0 %1295 }
0x12ed   :  { %v1298_v36 = vmul.f32 %v2181_v26, %v1296_v33  ;;  %v1860_v48 = vadd.f32 -1.0, %v1345_v45 }
0x12ef   :  { %1300 = vrot.lane.b32.xlu0 %v1298_v36, %s2352_s3  ;;  %v1354_v52 = vmul.f32 %v1860_v48, %v1352_v50 }
0x12f3   :  { %1347 = vrot.lane.b32.xlu0 %v2181_v26, %s2354_s20 }
0x12f7   :  { %1357 = vrot.lane.b32.xlu0 %v2181_v26, %s2352_s3 }
0x1361   :  { %v1301_v47 = vpop.permute.xlu0 %1300 }
0x1362   :  { %v1303_v4 = vadd.f32 %v1301_v47, %v1293_v46  ;;  %v2200_v47 = vld [vmem:[%s3015_s1] sm:$0x3]  ;;  %s2355_s1 = smov [#allocation10]  }
0x1363   :  { %vm1499_vm5 = vcmp.gt.s32.totalorder %v2200_v47, 7  ;;  %s1803_s23 = sshll.u32 %s2355_s1, 4  ;;  %s1804_s23 = int_to_ptr.vmem [resolvable:$true] %s1803_s23 }
0x1364   :  { %2182 = vtanh.f32 %v1303_v4  ;;  %v1335_v61 = vrot.slane %v1303_v4, %v2506_v43  ;;  %v1500_v48 = vsel %vm1499_vm5, 1, %v2353_v57  ;;  %s2267_s24 = scalar_lea.vmem %s1804_s23, 64  ;;  %p2272_p11 = scmp.lt.s32.totalorder %s1804_s23, %s1804_s23 }
0x1365   :  { %v1348_v49 = vpop.permute.xlu0 %1347  ;;  %p2268_p10 = scmp.ne.s32.totalorder %s1804_s23, %s2267_s24  ;;  %p2273_p12 = scmp.lt.s32.totalorder %s2267_s24, %s2267_s24 }
0x1366   :  { %v1349_v51 = vrot.slane %v1348_v49, 2 }
0x1367   :  { %p2274_p13 = por %p2273_p12, %p2272_p11 }
0x1368   :  { %v1351_v53 = vmul.f32 %v1349_v51, %v2814_v16 }
0x1369   :  { %v1358_v62 = vpop.permute.xlu0 %1357  ;;  %p2275_p0 = pnand %p2274_p13, %p2268_p10 }
0x136a   :  { %v1355_v55 = vadd.f32 %v1354_v52, %v1351_v53  ;;  %v1359_v1 = vrot.slane %v1358_v62, 2 }
0x136c   :  { %2184 = vtanh.f32 %v1355_v55  ;;  %v2876_v56 = vsel %vm1126_vm15, %v1355_v55, %v2814_v16 }
0x136e   :  { %v2183_v58 = vpop.eup %2182 }
0x136f   :  { %1306 = vrot.lane.b32.xlu1 %v2183_v58, %s2345_s2 }
0x1373   :  { %1313 = vperm.xlu1 %2130, %v1311_v59  }
0x1376   :  { %v2185_v2 = vpop.eup %2184 }
0x1377   :  { %v1361_v6 = vmul.f32 %v2185_v2, %v1359_v1 }
0x1379   :  { %v1364_v54 = vsel %vm1126_vm15, %v1361_v6, 0.0  ;;  %v2891_v18 = vsel %vm1126_vm15, %v1361_v6, %v2829_v7  ;;  %v1684_v7 = vld [vmem:[#allocation2] sm:$0xff] }
0x137a   :  { %1365 = vst.msk [vmem:[#allocation2 + $0xa] sm:$0x3] %vm419_vm6, %v1364_v54 }
0x13e1   :  { %v1307_v10 = vpop.permute.xlu1 %1306 }
0x13e2   :  { %v1309_v13 = vmul.f32 %v2181_v26, %v1307_v10 }
0x13e4   :  { %v1323_v16 = vrot.slane %v1309_v13, %v2506_v43 }
0x13e6   :  { %1366 = vrot.lane.b32.xlu1 %v1323_v16, %s2345_s2  ;;  %1324 = vrot.lane.b32.xlu0 %v1323_v16, %s2352_s3 }
0x13ea   :  { %1336 = vrot.lane.b32.xlu1 %v1335_v61, %s2354_s20  ;;  %1370 = vrot.lane.b32.xlu0 %v2891_v18, %s2345_s2 }
0x13f2   :  { %v2896_v11 = vpop.permute.xlu1 %1313 }
0x13f3   :  { %vm1315_vm2 = vcmp.eq.s32.totalorder %v2896_v11, 1 }
0x1458   :  { %v1325_v60 = vpop.permute.xlu0 %1324  ;;  %v1367_v17 = vpop.permute.xlu1 %1366 }
0x1459   :  { %v2902_v63 = vsel %vm1315_vm2, %v1325_v60, %v2840_v38  ;;  %v1376_v38 = vld [vmem:[#allocation3 + $0x1c] sm:$0xf] }
0x145a   :  { %v1373_v3 = vsel %vm237_vm1, %v2902_v63, %v1367_v17 }
0x145c   :  { %v1371_v28 = vpop.permute.xlu0 %1370  ;;  %v1337_v30 = vpop.permute.xlu1 %1336 }
0x145d   :  { %v1374_v5 = vsel %vm239_vm3, %v1373_v3, %v1371_v28  ;;  %v2910_v23 = vsel %vm1315_vm2, %v1337_v30, %v2848_v39 }
0x145e   :  { %v1478_v31 = vrot.slane %v2910_v23, %v2506_v43  ;;  %1861 = vmatmul.mubr.msk.f32.vlgmr.msra.gmra.mrb[6].mxu1 %vm92_vm4, %v1374_v5  ;;  %v1686_v5 = vld [vmem:[#allocation8] sm:$0xff] }
0x145f   :  { %1885 = vmatprep.mubr.msk.f32.mxu1 %vm237_vm1, %v1684_v7 }
0x1460   :  { %1479 = vrot.lane.b32.xlu1 %v1478_v31, %s2352_s3  ;;  %v1687_v31 = vld [vmem:[#allocation8 + $0x8] sm:$0xff] }
0x1461   :  { %v2104_v7 = vpack.c.bf16 %v1687_v31, %v1686_v5 }
0x1463   :  { %2105 = vmatprep.subr.bf16.mxu1 %v2104_v7 }
0x1464   :  { %2107 = vmatpush3.bf16.msra.mxu1 %v2104_v7 }
0x14d2   :  { %v1480_v15 = vpop.permute.xlu1 %1479 }
0x1531   :  { %v1446_v25 = vpop.f32.mrb[6].mxu1 }
0x1532   :  { %v1448_v24 = vpop.f32.mrb[7].mxu1 }
0x1533   :  { %v1453_v29 = vcombine.low %v1446_v25, %v1448_v24  ;;  %v1688_v25 = vld [vmem:[#allocation8 + $0x10] sm:$0xff]  ;;  %v1689_v24 = vld [vmem:[#allocation8 + $0x18] sm:$0xff] }
0x1535   :  { %v1460_v19 = vrot.slane %v1453_v29, %v2506_v43  ;;  %v2108_v29 = vpack.c.bf16 %v1689_v24, %v1688_v25 }
0x1537   :  { %v1462_v22 = vadd.f32 %v1460_v19, %v1376_v38  ;;  %2109 = vmatprep.subr.bf16.mxu1 %v2108_v29 }
0x1538   :  { %2111 = vmatpush3.bf16.msra.mxu1 %v2108_v29 }
0x1539   :  { %v1862_v12 = vmul.f32 -1.442695, %v1462_v22 }
0x153b   :  { %2186 = vpow2.f32 %v1862_v12 }
0x1545   :  { %v2187_v34 = vpop.eup %2186 }
0x1546   :  { %v1466_v39 = vadd.f32 1.0, %v2187_v34 }
0x1548   :  { %2188 = vrcp.f32 %v1466_v39 }
0x1552   :  { %v2189_v40 = vpop.eup %2188 }
0x1553   :  { %1530 = vrot.lane.b32.xlu1 %v2189_v40, %s2345_s2  ;;  %v1469_v0 = vmul.f32 2.0, %v2189_v40  ;;  %v1482_v37 = vmul.f32 %v2189_v40, %v1480_v15  ;;  %v1541_v36 = vrot.slane %v2189_v40, 2 }
0x1555   :  { %v1863_v8 = vadd.f32 -1.0, %v1469_v0 }
0x1557   :  { %1484 = vrot.lane.b32.xlu0 %v1863_v8, %s2345_s2 }
0x15c5   :  { %v1531_v35 = vpop.permute.xlu1 %1530 }
0x15c6   :  { %v1532_v20 = vrot.slane %v1531_v35, 2 }
0x15c8   :  { %v1534_v21 = vmul.f32 2.0, %v1532_v20 }
0x15c9   :  { %v1485_v9 = vpop.permute.xlu0 %1484 }
0x15ca   :  { %v1487_v14 = vmul.f32 %v2189_v40, %v1485_v9  ;;  %v1864_v32 = vadd.f32 -1.0, %v1534_v21 }
0x15cc   :  { %1489 = vrot.lane.b32.xlu0 %v1487_v14, %s2352_s3  ;;  %v1543_v42 = vmul.f32 %v1864_v32, %v1541_v36 }
0x15d0   :  { %1536 = vrot.lane.b32.xlu0 %v2189_v40, %s2354_s20 }
0x15d4   :  { %1546 = vrot.lane.b32.xlu0 %v2189_v40, %s2352_s3 }
0x163e   :  { %v1490_v26 = vpop.permute.xlu0 %1489 }
0x163f   :  { %v1492_v27 = vadd.f32 %v1490_v26, %v1482_v37 }
0x1641   :  { %2190 = vtanh.f32 %v1492_v27  ;;  %v1524_v30 = vrot.slane %v1492_v27, %v2506_v43 }
0x1642   :  { %v1537_v33 = vpop.permute.xlu0 %1536 }
0x1643   :  { %v1538_v41 = vrot.slane %v1537_v33, 2 }
0x1645   :  { %v1540_v44 = vmul.f32 %v1538_v41, %v2876_v56 }
0x1646   :  { %v1547_v49 = vpop.permute.xlu0 %1546 }
0x1647   :  { %v1544_v45 = vadd.f32 %v1543_v42, %v1540_v44  ;;  %v1548_v50 = vrot.slane %v1547_v49, 2 }
0x1649   :  { %2192 = vtanh.f32 %v1544_v45  ;;  %v2927_v46 = vsel %vm1315_vm2, %v1544_v45, %v2876_v56 }
0x164b   :  { %v2191_v4 = vpop.eup %2190 }
0x164c   :  { %1495 = vrot.lane.b32.xlu1 %v2191_v4, %s2345_s2 }
0x1650   :  { %1502 = vperm.xlu1 %2130, %v1500_v48  }
0x1653   :  { %v2193_v51 = vpop.eup %2192 }
0x1654   :  { %v1550_v52 = vmul.f32 %v2193_v51, %v1548_v50 }
0x1656   :  { %v1553_v53 = vsel %vm1315_vm2, %v1550_v52, 0.0  ;;  %v1551_v57 = vsel %vm1315_vm2, %v1550_v52, %v2891_v18  ;;  %v1565_v18 = vld [vmem:[#allocation3 + $0x20] sm:$0xf] }
0x1657   :  { %1554 = vst.msk [vmem:[#allocation2 + $0xc] sm:$0x3] %vm419_vm6, %v1553_v53 }
0x16be   :  { %v1496_v55 = vpop.permute.xlu1 %1495 }
0x16bf   :  { %v1498_v56 = vmul.f32 %v2189_v40, %v1496_v55 }
0x16c1   :  { %v1512_v58 = vrot.slane %v1498_v56, %v2506_v43 }
0x16c3   :  { %1555 = vrot.lane.b32.xlu1 %v1512_v58, %s2345_s2  ;;  %1513 = vrot.lane.b32.xlu0 %v1512_v58, %s2352_s3 }
0x16c7   :  { %1559 = vrot.lane.b32.xlu0 %v1551_v57, %s2345_s2 }
0x16cf   :  { %v1503_v59 = vpop.permute.xlu1 %1502 }
0x16d0   :  { %vm1504_vm7 = vcmp.eq.s32.totalorder %v1503_v59, 1 }
0x1735   :  { %v1514_v62 = vpop.permute.xlu0 %1513  ;;  %v1556_v2 = vpop.permute.xlu1 %1555 }
0x1736   :  { %v1516_v1 = vsel %vm1504_vm7, %v1514_v62, %v2902_v63 }
0x1737   :  { %1780 = vst.msk [vmem:[#allocation10] sm:$0x3] %vm419_vm6, %v1516_v1  ;;  %v1562_v6 = vsel %vm237_vm1, %v1516_v1, %v1556_v2 }
0x1739   :  { %v1560_v54 = vpop.permute.xlu0 %1559 }
0x173a   :  { %v1563_v10 = vsel %vm239_vm3, %v1562_v6, %v1560_v54 }
0x173b   :  { %1865 = vmatmul.mubr.msk.f32.vlgmr.msra.gmra.mrb[8].mxu0 %vm92_vm4, %v1563_v10 }
0x180e   :  { %v1635_v13 = vpop.f32.mrb[8].mxu0 }
0x180f   :  { %v1637_v16 = vpop.f32.mrb[9].mxu0 }
0x1810   :  { %v1642_v61 = vcombine.low %v1635_v13, %v1637_v16 }
0x1812   :  { %v1649_v11 = vrot.slane %v1642_v61, %v2506_v43 }
0x1814   :  { %v1651_v60 = vadd.f32 %v1649_v11, %v1565_v18 }
0x1816   :  { %v1866_v17 = vmul.f32 -1.442695, %v1651_v60 }
0x1818   :  { %2194 = vpow2.f32 %v1866_v17 }
0x1822   :  { %v2195_v63 = vpop.eup %2194 }
0x1823   :  { %v1655_v3 = vadd.f32 1.0, %v2195_v63 }
0x1825   :  { %2196 = vrcp.f32 %v1655_v3 }
0x182f   :  { %v2197_v28 = vpop.eup %2196 }
0x1830   :  { %1665 = vrot.lane.b32.xlu0 %v2197_v28, %s2354_s20  ;;  %1659 = vrot.lane.b32.xlu1 %v2197_v28, %s2345_s2  ;;  %v1670_v40 = vrot.slane %v2197_v28, 2 }
0x1834   :  { %1525 = vrot.lane.b32.xlu0 %v1524_v30, %s2354_s20  ;;  %1675 = vrot.lane.b32.xlu1 %v2197_v28, %s2352_s3 }
0x18a2   :  { %v1666_v38 = vpop.permute.xlu0 %1665  ;;  %v1660_v19 = vpop.permute.xlu1 %1659 }
0x18a3   :  { %v1661_v22 = vrot.slane %v1660_v19, 2  ;;  %v1667_v12 = vrot.slane %v1666_v38, 2 }
0x18a5   :  { %v1663_v34 = vmul.f32 2.0, %v1661_v22  ;;  %v1669_v8 = vmul.f32 %v1667_v12, %v2927_v46 }
0x18a6   :  { %v1526_v43 = vpop.permute.xlu0 %1525  ;;  %v1676_v35 = vpop.permute.xlu1 %1675 }
0x18a7   :  { %v1867_v39 = vadd.f32 -1.0, %v1663_v34  ;;  %v1528_v0 = vsel %vm1504_vm7, %v1526_v43, %v2910_v23  ;;  %v1677_v20 = vrot.slane %v1676_v35, 2 }
0x18a8   :  { %1781 = vst.msk [vmem:[#allocation12] sm:$0x3] %vm419_vm6, %v1528_v0 }
0x18a9   :  { %v1672_v9 = vmul.f32 %v1867_v39, %v1670_v40 }
0x18ab   :  { %v1673_v14 = vadd.f32 %v1672_v9, %v1669_v8 }
0x18ad   :  { %2198 = vtanh.f32 %v1673_v14  ;;  %v1681_v15 = vsel %vm1504_vm7, %v1673_v14, %v2927_v46 }
0x18ae   :  { %1785 = vst.msk [vmem:[#allocation12 + $0x2] sm:$0x3] %vm419_vm6, %v1681_v15 }
0x18b7   :  { %v2199_v21 = vpop.eup %2198 }
0x18b8   :  { %v1679_v37 = vmul.f32 %v2199_v21, %v1677_v20 }
0x18ba   :  { %v1680_v26 = vsel %vm1504_vm7, %v1679_v37, %v1551_v57  ;;  %v1682_v23 = vsel %vm1504_vm7, %v1679_v37, 0.0 }
0x18bb   :  { %1683 = vst.msk [vmem:[#allocation2 + $0xe] sm:$0x3] %vm419_vm6, %v1682_v23  ;;  %1783 = vst.msk [vmem:[#allocation10 + $0x2] sm:$0x3] %vm419_vm6, %v1680_v26 }
0x18c2   :  { %v1685_v27 = vld [vmem:[#allocation2 + $0x8] sm:$0xff] }
0x18c3   :  { %1886 = vmatmul.mubr.msk.f32.vlgmr.msra.gmra.mrb[8].mxu1 %vm237_vm1, %v1685_v27 }
0x18c4   :  { %2278 = shalt.err (!%p2275_p0)
}
0x18c5   :  { %s2279_s26 = scalar_lea.hbm %s3020_s6, 64 }
0x18c6   :  { %p2280_p1 = scmp.ne.s32.totalorder %s3020_s6, %s2279_s26  ;;  %p2283_p2 = scmp.lt.u32.totalorder %s2279_s26, %s3020_s6 }
0x18c8   :  { %p2285_p3 = pnand %p2283_p2, %p2280_p1 }
0x18ca   :  { %2288 = shalt.err (!%p2285_p3)
}
0x18cb   :  { %s2356_s8 = smov 2   ;;  %s2357_s11 = smov [#allocation12]  }
0x18cc   :  { %1809 = dma.vmem_to_hbm [thread:$0]  %s1804_s23, 64, %s3020_s6, [#allocation11], %s2352_s3, %s2352_s3, %s2356_s8  }
0x18cd   :  { %s1815_s12 = sshll.u32 %s2357_s11, 4  ;;  %s1816_s12 = int_to_ptr.vmem [resolvable:$true] %s1815_s12 }
0x18ce   :  { %s2289_s13 = scalar_lea.vmem %s1816_s12, 64  ;;  %p2294_p5 = scmp.lt.s32.totalorder %s1816_s12, %s1816_s12 }
0x18cf   :  { %p2290_p4 = scmp.ne.s32.totalorder %s1816_s12, %s2289_s13  ;;  %p2295_p6 = scmp.lt.s32.totalorder %s2289_s13, %s2289_s13 }
0x18d1   :  { %p2296_p7 = por %p2295_p6, %p2294_p5 }
0x18d3   :  { %p2297_p8 = pnand %p2296_p7, %p2290_p4 }
0x18d5   :  { %2300 = shalt.err (!%p2297_p8)
}
0x18d6   :  { %s2301_s17 = scalar_lea.hbm %s3021_s7, 64 }
0x18d7   :  { %p2302_p9 = scmp.ne.s32.totalorder %s3021_s7, %s2301_s17  ;;  %p2305_p10 = scmp.lt.u32.totalorder %s2301_s17, %s3021_s7 }
0x18d9   :  { %p2307_p11 = pnand %p2305_p10, %p2302_p9 }
0x18db   :  { %2310 = shalt.err (!%p2307_p11)
}
0x18dc   :  { %1821 = dma.vmem_to_hbm [thread:$0]  %s1816_s12, 64, %s3021_s7, [#allocation11], %s2352_s3, %s2352_s3, %s2356_s8  }
0x18dd   :  { %v1868_v32 = vld [vmem:[%s3018_s4] ss:$0 sm:$0xff]  ;;  %s2358_s24 = smov [#allocation9]  }
0x18de   :  { %s1791_s2 = sshll.u32 %s2358_s24, 4  ;;  %s1792_s2 = int_to_ptr.vmem [resolvable:$true] %s1791_s2 }
0x18df   :  { %s2311_s25 = scalar_lea.vmem %s1792_s2, 256  ;;  %p2316_p13 = scmp.lt.s32.totalorder %s1792_s2, %s1792_s2 }
0x18e0   :  { %p2312_p12 = scmp.ne.s32.totalorder %s1792_s2, %s2311_s25  ;;  %p2317_p0 = scmp.lt.s32.totalorder %s2311_s25, %s2311_s25 }
0x18e2   :  { %p2318_p1 = por %p2317_p0, %p2316_p13 }
0x18e4   :  { %p2319_p2 = pnand %p2318_p1, %p2312_p12 }
0x1996   :  { %v1887_v33 = vpop.f32.mrb[8].mxu1 }
0x1997   :  { %v1775_v36 = vadd.f32 %v1887_v33, %v1868_v32  ;;  %v1769_v41 = vpop.f32.mrb[9].mxu1 }
0x1998   :  { %v1770_v42 = vadd.f32 %v1868_v32, %v1769_v41 }
0x1999   :  { %1779 = vst [vmem:[#allocation9 + $0x8] sm:$0xff] %v1775_v36 }
0x199a   :  { %1778 = vst [vmem:[#allocation9] sm:$0xff] %v1770_v42 }
0x199b   :  { %2322 = shalt.err (!%p2319_p2)
}
0x199c   :  { %s2323_s4 = scalar_lea.hbm %s3019_s5, 256 }
0x199d   :  { %p2324_p3 = scmp.ne.s32.totalorder %s3019_s5, %s2323_s4  ;;  %p2327_p4 = scmp.lt.u32.totalorder %s2323_s4, %s3019_s5 }
0x199f   :  { %p2329_p5 = pnand %p2327_p4, %p2324_p3 }
0x19a1   :  { %2332 = shalt.err (!%p2329_p5)
}
0x19a2   :  { %1797 = dma.vmem_to_hbm [thread:$0]  %s1792_s2, 256, %s3019_s5, [#allocation5], %s2348_s0, %s2348_s0, %s2349_s15  }
0x19a3   :  { %2337 = dma.done.wait [#allocation5], 256  }
0x19a4   :  { %2338 = vsyncadd [#allocation5], 4294967040 }
0x19a5   :  { %2339 = dma.done.wait [#allocation11], 128  }
0x19a6   :  { %2340 = vsyncadd [#allocation11], 4294967168 }
0x19a7   :  { %1831 = vsyncpa [#allocation4], 1 }
0x19a8   :  { %1832 = vsyncpa [#allocation7], 1 }
0x19a9   :  { %1833 = vsyncpa [#allocation5], 1 }
0x19aa   :  { %1834 = vsyncpa [#allocation11], 1 }

</bundles_post_ra>
